<compile_context>
chip_gen: v7x
topology: tpu7x:2x2x1
jax: 0.10.0
libtpu: 0.0.40
codegen_flags: <defaults>
</compile_context>

<pallas_src>
import functools

import jax
import jax.numpy as jnp
from jax.experimental import pallas as pl
from jax.experimental.pallas import tpu as pltpu


def _round_up(x, m):
    return (x + m - 1) // m * m


# ----------------------------------------------------------------------------
# Pallas kernel: out = act(A @ W + b), tiled over M
# ----------------------------------------------------------------------------
def _fused_gemm_kernel(a_ref, w_ref, b_ref, o_ref, *, act):
    # bf16 x bf16 -> f32 accumulation on the MXU
    acc = jnp.dot(a_ref[...], w_ref[...], preferred_element_type=jnp.float32)
    acc = acc + b_ref[...]                      # (1, N) f32 bias broadcast
    if act == "relu":
        acc = jnp.maximum(acc, 0.0)
    elif act == "sigmoid":
        # exp + approximate reciprocal both go to the EUP slot; clamp keeps the
        # approx reciprocal from nudging the result above 1.0.
        acc = jnp.minimum(pl.reciprocal(1.0 + jnp.exp(-acc), approx=True), 1.0)
    o_ref[...] = acc.astype(o_ref.dtype)


def fused_gemm(a, w, b, act, out_dtype=jnp.bfloat16, tm=512):
    """act(a @ w + b).  a:(M,K) -> bf16, w:(K,N) bf16, b:(N,) f32 -> (M,N)."""
    M, K = a.shape
    N = w.shape[1]
    a = a.astype(jnp.bfloat16)

    tm = min(tm, _round_up(M, 8))               # adapt tile to small problems
    Mp = _round_up(M, tm)
    if Mp != M:                                 # pad only M (grid dimension)
        a = jnp.pad(a, ((0, Mp - M), (0, 0)))
    b2 = b.reshape(1, N).astype(jnp.float32)

    out = pl.pallas_call(
        functools.partial(_fused_gemm_kernel, act=act),
        out_shape=jax.ShapeDtypeStruct((Mp, N), out_dtype),
        grid=(Mp // tm,),
        in_specs=[
            pl.BlockSpec((tm, K), lambda i: (i, 0)),   # A: tiled over M
            pl.BlockSpec((K, N), lambda i: (0, 0)),    # W: resident
            pl.BlockSpec((1, N), lambda i: (0, 0)),    # bias: resident
        ],
        out_specs=pl.BlockSpec((tm, N), lambda i: (i, 0)),
        compiler_params=pltpu.CompilerParams(
            dimension_semantics=("parallel",)),        # megacore-shardable
    )(a, w, b2)
    return out[:M] if Mp != M else out


# ----------------------------------------------------------------------------
# JAX glue: encoder conv (im2col) and decoder deconv (phase fold)
# ----------------------------------------------------------------------------
def _im2col3x3_s2(x):
    """x:(N,H,W,C) NHWC, k=3, stride=2, pad=1 -> (N*Ho*Wo, 9*C), order [kh,kw,c]."""
    n, h, w, c = x.shape
    xp = jnp.pad(x, ((0, 0), (1, 1), (1, 1), (0, 0)))
    hp, wp = h + 2, w + 2
    ho = (hp - 3) // 2 + 1
    wo = (wp - 3) // 2 + 1
    cols = []
    for i in range(3):
        for j in range(3):
            cols.append(xp[:, i:i + 2 * (ho - 1) + 1:2,
                              j:j + 2 * (wo - 1) + 1:2, :])
    patches = jnp.stack(cols, axis=3)            # (n, ho, wo, 9, c)
    return patches.reshape(n * ho * wo, 9 * c), ho, wo


def conv2d_s2(x, wmat, b, act, out_dtype):
    """3x3 / stride 2 / pad 1 conv; wmat is the pre-packed (9*Cin, Cout) matrix."""
    n = x.shape[0]
    cout = wmat.shape[1]
    patches, ho, wo = _im2col3x3_s2(x)
    out = fused_gemm(patches, wmat, b, act, out_dtype)
    return out.reshape(n, ho, wo, cout)


def conv_transpose2d_s2(x, wmat_fold, b_fold, act, out_dtype):
    """3x3 / stride 2 / pad 1 / out_pad 1 transposed conv via phase decomposition.

    One GEMM on 2x2 high-padded patches of the UN-dilated input against the
    phase-folded weight (4*Cin, 4*Cout), followed by depth-to-space.
    """
    n, h, w, c = x.shape
    cout = wmat_fold.shape[1] // 4
    xp = jnp.pad(x, ((0, 0), (0, 1), (0, 1), (0, 0)))          # high-side pad
    cols = [xp[:, di:di + h, dj:dj + w, :] for di in (0, 1) for dj in (0, 1)]
    patches = jnp.stack(cols, axis=3).reshape(n * h * w, 4 * c)  # [(di,dj),c]
    out = fused_gemm(patches, wmat_fold, b_fold, act, out_dtype)
    out = out.reshape(n, h, w, 2, 2, cout)                      # (.., ph, pw, c)
    out = jnp.transpose(out, (0, 1, 3, 2, 4, 5))                # (n,h,ph,w,pw,c)
    return out.reshape(n, 2 * h, 2 * w, cout)                   # depth-to-space


# ----------------------------------------------------------------------------
# One-time parameter prep (hoisted out of the forward pass)
# ----------------------------------------------------------------------------
def prep_conv_weight(w):
    """PyTorch Conv2d (Cout,Cin,3,3) -> (9*Cin, Cout) bf16, K order [kh,kw,cin]."""
    cout, cin = w.shape[0], w.shape[1]
    return jnp.transpose(w, (2, 3, 1, 0)).reshape(9 * cin, cout).astype(jnp.bfloat16)


def prep_deconv_weight(w):
    """PyTorch ConvTranspose2d (Cin,Cout,3,3), stride=2/pad=1/out_pad=1
    -> phase-folded (4*Cin, 4*Cout) bf16.

    y[2m+ph, 2n+pw, co] = sum_{di,dj,ci} x[m+di, n+dj, ci] * Wf[(di,dj,ci),(ph,pw,co)]
    with kernel taps: (phase 0, offset 0)->k=1, (1,0)->k=2, (1,1)->k=0, (0,1)->none.
    """
    cin, cout = w.shape[0], w.shape[1]
    tap = {(0, 0): 1, (1, 0): 2, (1, 1): 0}
    wf = jnp.zeros((2, 2, cin, 2, 2, cout), jnp.float32)
    for ph in (0, 1):
        for pw in (0, 1):
            for di in (0, 1):
                for dj in (0, 1):
                    kh = tap.get((ph, di))
                    kw = tap.get((pw, dj))
                    if kh is None or kw is None:
                        continue
                    wf = wf.at[di, dj, :, ph, pw, :].set(w[:, :, kh, kw])
    return wf.reshape(4 * cin, 4 * cout).astype(jnp.bfloat16)


def prep_deconv_bias(b):
    return jnp.tile(b, 4).astype(jnp.float32)    # index = (ph*2+pw)*Cout + co


def prep_params(raw):
    (w1, b1), (w2, b2), (w3, b3), (w4, b4), (w5, b5), (w6, b6) = raw
    return [
        (prep_conv_weight(w1), b1),
        (prep_conv_weight(w2), b2),
        (prep_conv_weight(w3), b3),
        (prep_deconv_weight(w4), prep_deconv_bias(b4)),
        (prep_deconv_weight(w5), prep_deconv_bias(b5)),
        (prep_deconv_weight(w6), prep_deconv_bias(b6)),
    ]


# ----------------------------------------------------------------------------
# Parameters (deterministic, PyTorch-default-style uniform init, raw layouts)
# ----------------------------------------------------------------------------
def init_params(key):
    def _uniform_pair(key, w_shape, fan_in, bias_len):
        bound = 1.0 / jnp.sqrt(float(fan_in))
        kw, kb = jax.random.split(key)
        w = jax.random.uniform(kw, w_shape, jnp.float32, -bound, bound)
        b = jax.random.uniform(kb, (bias_len,), jnp.float32, -bound, bound)
        return w, b

    keys = jax.random.split(key, 6)
    params = []
    # encoder Conv2d weights: (Cout, Cin, 3, 3)
    params.append(_uniform_pair(keys[0], (32, 6, 3, 3), 6 * 9, 32))
    params.append(_uniform_pair(keys[1], (64, 32, 3, 3), 32 * 9, 64))
    params.append(_uniform_pair(keys[2], (128, 64, 3, 3), 64 * 9, 128))
    # decoder ConvTranspose2d weights: (Cin, Cout, 3, 3)
    params.append(_uniform_pair(keys[3], (128, 64, 3, 3), 64 * 9, 64))
    params.append(_uniform_pair(keys[4], (64, 32, 3, 3), 32 * 9, 32))
    params.append(_uniform_pair(keys[5], (32, 6, 3, 3), 6 * 9, 6))
    return params


def autoencoder_forward(x_nchw, prepped):
    """Matches AutoEncoder.forward: NCHW (N,6,H,W) in -> NCHW (N,6,H,W) out."""
    x = jnp.transpose(x_nchw, (0, 2, 3, 1)).astype(jnp.bfloat16)   # NCHW -> NHWC
    (w1, b1), (w2, b2), (w3, b3), (w4, b4), (w5, b5), (w6, b6) = prepped
    # encoder
    x = conv2d_s2(x, w1, b1, "relu", jnp.bfloat16)
    x = conv2d_s2(x, w2, b2, "relu", jnp.bfloat16)
    x = conv2d_s2(x, w3, b3, "relu", jnp.bfloat16)
    # decoder (phase-decomposed transposed convs)
    x = conv_transpose2d_s2(x, w4, b4, "relu", jnp.bfloat16)
    x = conv_transpose2d_s2(x, w5, b5, "relu", jnp.bfloat16)
    x = conv_transpose2d_s2(x, w6, b6, "sigmoid", jnp.float32)
    return jnp.transpose(x, (0, 3, 1, 2))        # NHWC -> NCHW


if __name__ == "__main__":
    key = jax.random.PRNGKey(0)
    kx, kp = jax.random.split(key)
    # small, module-consistent shape: batch=2, channels=6, spatial=16
    x = jax.random.uniform(kx, (2, 6, 16, 16), jnp.float32)
    raw_params = init_params(kp)
    prepped = prep_params(raw_params)            # one-time weight repack (bf16)

    out = jax.jit(autoencoder_forward)(x, prepped)
    out = jax.block_until_ready(out)

    assert out.shape == (2, 6, 16, 16), out.shape
    assert bool(jnp.all(jnp.isfinite(out)))
    assert bool(jnp.all((out >= 0.0) & (out <= 1.0)))   # sigmoid range
    print("KERNEL_OK")
</pallas_src>

<mosaic_0001>
module attributes {stable_mosaic.version = 11 : i64} {
  func.func @_fused_gemm_kernel(%arg0: i32, %arg1: memref<128x54xbf16, #tpu.memory_space<vmem>>, %arg2: memref<54x32xbf16, #tpu.memory_space<vmem>>, %arg3: memref<1x32xf32, #tpu.memory_space<vmem>>, %arg4: memref<128x32xbf16, #tpu.memory_space<vmem>>) attributes {dimension_semantics = [#tpu.dimension_semantics<parallel>], iteration_bounds = array<i64: 1>, scalar_prefetch = 0 : i64, scratch_operands = 0 : i64, tpu.core_type = #tpu.core_type<tc>, window_params = [{transform_indices = @transform_0, window_bounds = array<i64: 128, 54>}, {pipeline_mode = #tpu.pipeline_mode<synchronous>, transform_indices = @transform_1, window_bounds = array<i64: 54, 32>}, {pipeline_mode = #tpu.pipeline_mode<synchronous>, transform_indices = @transform_2, window_bounds = array<i64: 1, 32>}, {transform_indices = @transform_3, window_bounds = array<i64: 128, 32>}]} {
    %c0 = arith.constant 0 : index
    %c0_0 = arith.constant 0 : index
    %0 = vector.load %arg1[%c0, %c0_0] : memref<128x54xbf16, #tpu.memory_space<vmem>>, vector<128x54xbf16>
    %c0_1 = arith.constant 0 : index
    %c0_2 = arith.constant 0 : index
    %1 = vector.load %arg2[%c0_1, %c0_2] : memref<54x32xbf16, #tpu.memory_space<vmem>>, vector<54x32xbf16>
    %cst = arith.constant dense<0.000000e+00> : vector<128x32xf32>
    %2 = tpu.matmul %0, %1, %cst {dimension_numbers = #tpu.dot_dimension_numbers<[1], [0], [0], [1], [0, 0, 1, 1], [], []>} : vector<128x54xbf16>, vector<54x32xbf16>, vector<128x32xf32> -> vector<128x32xf32>
    %c0_3 = arith.constant 0 : index
    %c0_4 = arith.constant 0 : index
    %3 = vector.load %arg3[%c0_3, %c0_4] : memref<1x32xf32, #tpu.memory_space<vmem>>, vector<1x32xf32>
    %4 = vector.broadcast %3 : vector<1x32xf32> to vector<128x32xf32>
    %5 = arith.addf %2, %4 : vector<128x32xf32>
    %cst_5 = arith.constant 0.000000e+00 : f32
    %6 = vector.broadcast %cst_5 : f32 to vector<128x32xf32>
    %7 = arith.maximumf %5, %6 : vector<128x32xf32>
    %8 = arith.truncf %7 : vector<128x32xf32> to vector<128x32xbf16>
    %c0_6 = arith.constant 0 : index
    %c0_7 = arith.constant 0 : index
    %9 = vector.load %arg4[%c0_6, %c0_7] : memref<128x32xbf16, #tpu.memory_space<vmem>>, vector<128x32xbf16>
    tpu.vector_store %arg4[%c0_6, %c0_7], %8 {strides = array<i32>} : memref<128x32xbf16, #tpu.memory_space<vmem>>, vector<128x32xbf16>,
    return
  }
  func.func @transform_0(%arg0: i32) -> (i32, i32) {
    %c0_i32 = arith.constant 0 : i32
    %c0_i32_0 = arith.constant 0 : i32
    return %arg0, %c0_i32 : i32, i32
  }
  func.func @transform_1(%arg0: i32) -> (i32, i32) {
    %c0_i32 = arith.constant 0 : i32
    %c0_i32_0 = arith.constant 0 : i32
    %c0_i32_1 = arith.constant 0 : i32
    return %c0_i32, %c0_i32_0 : i32, i32
  }
  func.func @transform_2(%arg0: i32) -> (i32, i32) {
    %c0_i32 = arith.constant 0 : i32
    %c0_i32_0 = arith.constant 0 : i32
    %c0_i32_1 = arith.constant 0 : i32
    return %c0_i32, %c0_i32_0 : i32, i32
  }
  func.func @transform_3(%arg0: i32) -> (i32, i32) {
    %c0_i32 = arith.constant 0 : i32
    %c0_i32_0 = arith.constant 0 : i32
    return %arg0, %c0_i32 : i32, i32
  }
}

module attributes {stable_mosaic.version = 11 : i64} {
  func.func @_fused_gemm_kernel(%arg0: i32, %arg1: memref<32x288xbf16, #tpu.memory_space<vmem>>, %arg2: memref<288x64xbf16, #tpu.memory_space<vmem>>, %arg3: memref<1x64xf32, #tpu.memory_space<vmem>>, %arg4: memref<32x64xbf16, #tpu.memory_space<vmem>>) attributes {dimension_semantics = [#tpu.dimension_semantics<parallel>], iteration_bounds = array<i64: 1>, scalar_prefetch = 0 : i64, scratch_operands = 0 : i64, tpu.core_type = #tpu.core_type<tc>, window_params = [{transform_indices = @transform_0, window_bounds = array<i64: 32, 288>}, {pipeline_mode = #tpu.pipeline_mode<synchronous>, transform_indices = @transform_1, window_bounds = array<i64: 288, 64>}, {pipeline_mode = #tpu.pipeline_mode<synchronous>, transform_indices = @transform_2, window_bounds = array<i64: 1, 64>}, {transform_indices = @transform_3, window_bounds = array<i64: 32, 64>}]} {
    %c0 = arith.constant 0 : index
    %c0_0 = arith.constant 0 : index
    %0 = vector.load %arg1[%c0, %c0_0] : memref<32x288xbf16, #tpu.memory_space<vmem>>, vector<32x288xbf16>
    %c0_1 = arith.constant 0 : index
    %c0_2 = arith.constant 0 : index
    %1 = vector.load %arg2[%c0_1, %c0_2] : memref<288x64xbf16, #tpu.memory_space<vmem>>, vector<288x64xbf16>
    %cst = arith.constant dense<0.000000e+00> : vector<32x64xf32>
    %2 = tpu.matmul %0, %1, %cst {dimension_numbers = #tpu.dot_dimension_numbers<[1], [0], [0], [1], [0, 0, 1, 1], [], []>} : vector<32x288xbf16>, vector<288x64xbf16>, vector<32x64xf32> -> vector<32x64xf32>
    %c0_3 = arith.constant 0 : index
    %c0_4 = arith.constant 0 : index
    %3 = vector.load %arg3[%c0_3, %c0_4] : memref<1x64xf32, #tpu.memory_space<vmem>>, vector<1x64xf32>
    %4 = vector.broadcast %3 : vector<1x64xf32> to vector<32x64xf32>
    %5 = arith.addf %2, %4 : vector<32x64xf32>
    %cst_5 = arith.constant 0.000000e+00 : f32
    %6 = vector.broadcast %cst_5 : f32 to vector<32x64xf32>
    %7 = arith.maximumf %5, %6 : vector<32x64xf32>
    %8 = arith.truncf %7 : vector<32x64xf32> to vector<32x64xbf16>
    %c0_6 = arith.constant 0 : index
    %c0_7 = arith.constant 0 : index
    %9 = vector.load %arg4[%c0_6, %c0_7] : memref<32x64xbf16, #tpu.memory_space<vmem>>, vector<32x64xbf16>
    tpu.vector_store %arg4[%c0_6, %c0_7], %8 {strides = array<i32>} : memref<32x64xbf16, #tpu.memory_space<vmem>>, vector<32x64xbf16>,
    return
  }
  func.func @transform_0(%arg0: i32) -> (i32, i32) {
    %c0_i32 = arith.constant 0 : i32
    %c0_i32_0 = arith.constant 0 : i32
    return %arg0, %c0_i32 : i32, i32
  }
  func.func @transform_1(%arg0: i32) -> (i32, i32) {
    %c0_i32 = arith.constant 0 : i32
    %c0_i32_0 = arith.constant 0 : i32
    %c0_i32_1 = arith.constant 0 : i32
    return %c0_i32, %c0_i32_0 : i32, i32
  }
  func.func @transform_2(%arg0: i32) -> (i32, i32) {
    %c0_i32 = arith.constant 0 : i32
    %c0_i32_0 = arith.constant 0 : i32
    %c0_i32_1 = arith.constant 0 : i32
    return %c0_i32, %c0_i32_0 : i32, i32
  }
  func.func @transform_3(%arg0: i32) -> (i32, i32) {
    %c0_i32 = arith.constant 0 : i32
    %c0_i32_0 = arith.constant 0 : i32
    return %arg0, %c0_i32 : i32, i32
  }
}

module attributes {stable_mosaic.version = 11 : i64} {
  func.func @_fused_gemm_kernel(%arg0: i32, %arg1: memref<8x576xbf16, #tpu.memory_space<vmem>>, %arg2: memref<576x128xbf16, #tpu.memory_space<vmem>>, %arg3: memref<1x128xf32, #tpu.memory_space<vmem>>, %arg4: memref<8x128xbf16, #tpu.memory_space<vmem>>) attributes {dimension_semantics = [#tpu.dimension_semantics<parallel>], iteration_bounds = array<i64: 1>, scalar_prefetch = 0 : i64, scratch_operands = 0 : i64, tpu.core_type = #tpu.core_type<tc>, window_params = [{transform_indices = @transform_0, window_bounds = array<i64: 8, 576>}, {pipeline_mode = #tpu.pipeline_mode<synchronous>, transform_indices = @transform_1, window_bounds = array<i64: 576, 128>}, {pipeline_mode = #tpu.pipeline_mode<synchronous>, transform_indices = @transform_2, window_bounds = array<i64: 1, 128>}, {transform_indices = @transform_3, window_bounds = array<i64: 8, 128>}]} {
    %c0 = arith.constant 0 : index
    %c0_0 = arith.constant 0 : index
    %0 = vector.load %arg1[%c0, %c0_0] : memref<8x576xbf16, #tpu.memory_space<vmem>>, vector<8x576xbf16>
    %c0_1 = arith.constant 0 : index
    %c0_2 = arith.constant 0 : index
    %1 = vector.load %arg2[%c0_1, %c0_2] : memref<576x128xbf16, #tpu.memory_space<vmem>>, vector<576x128xbf16>
    %cst = arith.constant dense<0.000000e+00> : vector<8x128xf32>
    %2 = tpu.matmul %0, %1, %cst {dimension_numbers = #tpu.dot_dimension_numbers<[1], [0], [0], [1], [0, 0, 1, 1], [], []>} : vector<8x576xbf16>, vector<576x128xbf16>, vector<8x128xf32> -> vector<8x128xf32>
    %c0_3 = arith.constant 0 : index
    %c0_4 = arith.constant 0 : index
    %3 = vector.load %arg3[%c0_3, %c0_4] : memref<1x128xf32, #tpu.memory_space<vmem>>, vector<1x128xf32>
    %4 = vector.broadcast %3 : vector<1x128xf32> to vector<8x128xf32>
    %5 = arith.addf %2, %4 : vector<8x128xf32>
    %cst_5 = arith.constant 0.000000e+00 : f32
    %6 = vector.broadcast %cst_5 : f32 to vector<8x128xf32>
    %7 = arith.maximumf %5, %6 : vector<8x128xf32>
    %8 = arith.truncf %7 : vector<8x128xf32> to vector<8x128xbf16>
    %c0_6 = arith.constant 0 : index
    %c0_7 = arith.constant 0 : index
    %9 = vector.load %arg4[%c0_6, %c0_7] : memref<8x128xbf16, #tpu.memory_space<vmem>>, vector<8x128xbf16>
    tpu.vector_store %arg4[%c0_6, %c0_7], %8 {strides = array<i32>} : memref<8x128xbf16, #tpu.memory_space<vmem>>, vector<8x128xbf16>,
    return
  }
  func.func @transform_0(%arg0: i32) -> (i32, i32) {
    %c0_i32 = arith.constant 0 : i32
    %c0_i32_0 = arith.constant 0 : i32
    return %arg0, %c0_i32 : i32, i32
  }
  func.func @transform_1(%arg0: i32) -> (i32, i32) {
    %c0_i32 = arith.constant 0 : i32
    %c0_i32_0 = arith.constant 0 : i32
    %c0_i32_1 = arith.constant 0 : i32
    return %c0_i32, %c0_i32_0 : i32, i32
  }
  func.func @transform_2(%arg0: i32) -> (i32, i32) {
    %c0_i32 = arith.constant 0 : i32
    %c0_i32_0 = arith.constant 0 : i32
    %c0_i32_1 = arith.constant 0 : i32
    return %c0_i32, %c0_i32_0 : i32, i32
  }
  func.func @transform_3(%arg0: i32) -> (i32, i32) {
    %c0_i32 = arith.constant 0 : i32
    %c0_i32_0 = arith.constant 0 : i32
    return %arg0, %c0_i32 : i32, i32
  }
}

module attributes {stable_mosaic.version = 11 : i64} {
  func.func @_fused_gemm_kernel(%arg0: i32, %arg1: memref<8x512xbf16, #tpu.memory_space<vmem>>, %arg2: memref<512x256xbf16, #tpu.memory_space<vmem>>, %arg3: memref<1x256xf32, #tpu.memory_space<vmem>>, %arg4: memref<8x256xbf16, #tpu.memory_space<vmem>>) attributes {dimension_semantics = [#tpu.dimension_semantics<parallel>], iteration_bounds = array<i64: 1>, scalar_prefetch = 0 : i64, scratch_operands = 0 : i64, tpu.core_type = #tpu.core_type<tc>, window_params = [{transform_indices = @transform_0, window_bounds = array<i64: 8, 512>}, {pipeline_mode = #tpu.pipeline_mode<synchronous>, transform_indices = @transform_1, window_bounds = array<i64: 512, 256>}, {pipeline_mode = #tpu.pipeline_mode<synchronous>, transform_indices = @transform_2, window_bounds = array<i64: 1, 256>}, {transform_indices = @transform_3, window_bounds = array<i64: 8, 256>}]} {
    %c0 = arith.constant 0 : index
    %c0_0 = arith.constant 0 : index
    %0 = vector.load %arg1[%c0, %c0_0] : memref<8x512xbf16, #tpu.memory_space<vmem>>, vector<8x512xbf16>
    %c0_1 = arith.constant 0 : index
    %c0_2 = arith.constant 0 : index
    %1 = vector.load %arg2[%c0_1, %c0_2] : memref<512x256xbf16, #tpu.memory_space<vmem>>, vector<512x256xbf16>
    %cst = arith.constant dense<0.000000e+00> : vector<8x256xf32>
    %2 = tpu.matmul %0, %1, %cst {dimension_numbers = #tpu.dot_dimension_numbers<[1], [0], [0], [1], [0, 0, 1, 1], [], []>} : vector<8x512xbf16>, vector<512x256xbf16>, vector<8x256xf32> -> vector<8x256xf32>
    %c0_3 = arith.constant 0 : index
    %c0_4 = arith.constant 0 : index
    %3 = vector.load %arg3[%c0_3, %c0_4] : memref<1x256xf32, #tpu.memory_space<vmem>>, vector<1x256xf32>
    %4 = vector.broadcast %3 : vector<1x256xf32> to vector<8x256xf32>
    %5 = arith.addf %2, %4 : vector<8x256xf32>
    %cst_5 = arith.constant 0.000000e+00 : f32
    %6 = vector.broadcast %cst_5 : f32 to vector<8x256xf32>
    %7 = arith.maximumf %5, %6 : vector<8x256xf32>
    %8 = arith.truncf %7 : vector<8x256xf32> to vector<8x256xbf16>
    %c0_6 = arith.constant 0 : index
    %c0_7 = arith.constant 0 : index
    %9 = vector.load %arg4[%c0_6, %c0_7] : memref<8x256xbf16, #tpu.memory_space<vmem>>, vector<8x256xbf16>
    tpu.vector_store %arg4[%c0_6, %c0_7], %8 {strides = array<i32>} : memref<8x256xbf16, #tpu.memory_space<vmem>>, vector<8x256xbf16>,
    return
  }
  func.func @transform_0(%arg0: i32) -> (i32, i32) {
    %c0_i32 = arith.constant 0 : i32
    %c0_i32_0 = arith.constant 0 : i32
    return %arg0, %c0_i32 : i32, i32
  }
  func.func @transform_1(%arg0: i32) -> (i32, i32) {
    %c0_i32 = arith.constant 0 : i32
    %c0_i32_0 = arith.constant 0 : i32
    %c0_i32_1 = arith.constant 0 : i32
    return %c0_i32, %c0_i32_0 : i32, i32
  }
  func.func @transform_2(%arg0: i32) -> (i32, i32) {
    %c0_i32 = arith.constant 0 : i32
    %c0_i32_0 = arith.constant 0 : i32
    %c0_i32_1 = arith.constant 0 : i32
    return %c0_i32, %c0_i32_0 : i32, i32
  }
  func.func @transform_3(%arg0: i32) -> (i32, i32) {
    %c0_i32 = arith.constant 0 : i32
    %c0_i32_0 = arith.constant 0 : i32
    return %arg0, %c0_i32 : i32, i32
  }
}

module attributes {stable_mosaic.version = 11 : i64} {
  func.func @_fused_gemm_kernel(%arg0: i32, %arg1: memref<32x256xbf16, #tpu.memory_space<vmem>>, %arg2: memref<256x128xbf16, #tpu.memory_space<vmem>>, %arg3: memref<1x128xf32, #tpu.memory_space<vmem>>, %arg4: memref<32x128xbf16, #tpu.memory_space<vmem>>) attributes {dimension_semantics = [#tpu.dimension_semantics<parallel>], iteration_bounds = array<i64: 1>, scalar_prefetch = 0 : i64, scratch_operands = 0 : i64, tpu.core_type = #tpu.core_type<tc>, window_params = [{transform_indices = @transform_0, window_bounds = array<i64: 32, 256>}, {pipeline_mode = #tpu.pipeline_mode<synchronous>, transform_indices = @transform_1, window_bounds = array<i64: 256, 128>}, {pipeline_mode = #tpu.pipeline_mode<synchronous>, transform_indices = @transform_2, window_bounds = array<i64: 1, 128>}, {transform_indices = @transform_3, window_bounds = array<i64: 32, 128>}]} {
    %c0 = arith.constant 0 : index
    %c0_0 = arith.constant 0 : index
    %0 = vector.load %arg1[%c0, %c0_0] : memref<32x256xbf16, #tpu.memory_space<vmem>>, vector<32x256xbf16>
    %c0_1 = arith.constant 0 : index
    %c0_2 = arith.constant 0 : index
    %1 = vector.load %arg2[%c0_1, %c0_2] : memref<256x128xbf16, #tpu.memory_space<vmem>>, vector<256x128xbf16>
    %cst = arith.constant dense<0.000000e+00> : vector<32x128xf32>
    %2 = tpu.matmul %0, %1, %cst {dimension_numbers = #tpu.dot_dimension_numbers<[1], [0], [0], [1], [0, 0, 1, 1], [], []>} : vector<32x256xbf16>, vector<256x128xbf16>, vector<32x128xf32> -> vector<32x128xf32>
    %c0_3 = arith.constant 0 : index
    %c0_4 = arith.constant 0 : index
    %3 = vector.load %arg3[%c0_3, %c0_4] : memref<1x128xf32, #tpu.memory_space<vmem>>, vector<1x128xf32>
    %4 = vector.broadcast %3 : vector<1x128xf32> to vector<32x128xf32>
    %5 = arith.addf %2, %4 : vector<32x128xf32>
    %cst_5 = arith.constant 0.000000e+00 : f32
    %6 = vector.broadcast %cst_5 : f32 to vector<32x128xf32>
    %7 = arith.maximumf %5, %6 : vector<32x128xf32>
    %8 = arith.truncf %7 : vector<32x128xf32> to vector<32x128xbf16>
    %c0_6 = arith.constant 0 : index
    %c0_7 = arith.constant 0 : index
    %9 = vector.load %arg4[%c0_6, %c0_7] : memref<32x128xbf16, #tpu.memory_space<vmem>>, vector<32x128xbf16>
    tpu.vector_store %arg4[%c0_6, %c0_7], %8 {strides = array<i32>} : memref<32x128xbf16, #tpu.memory_space<vmem>>, vector<32x128xbf16>,
    return
  }
  func.func @transform_0(%arg0: i32) -> (i32, i32) {
    %c0_i32 = arith.constant 0 : i32
    %c0_i32_0 = arith.constant 0 : i32
    return %arg0, %c0_i32 : i32, i32
  }
  func.func @transform_1(%arg0: i32) -> (i32, i32) {
    %c0_i32 = arith.constant 0 : i32
    %c0_i32_0 = arith.constant 0 : i32
    %c0_i32_1 = arith.constant 0 : i32
    return %c0_i32, %c0_i32_0 : i32, i32
  }
  func.func @transform_2(%arg0: i32) -> (i32, i32) {
    %c0_i32 = arith.constant 0 : i32
    %c0_i32_0 = arith.constant 0 : i32
    %c0_i32_1 = arith.constant 0 : i32
    return %c0_i32, %c0_i32_0 : i32, i32
  }
  func.func @transform_3(%arg0: i32) -> (i32, i32) {
    %c0_i32 = arith.constant 0 : i32
    %c0_i32_0 = arith.constant 0 : i32
    return %arg0, %c0_i32 : i32, i32
  }
}

module attributes {stable_mosaic.version = 11 : i64} {
  func.func @_fused_gemm_kernel(%arg0: i32, %arg1: memref<128x128xbf16, #tpu.memory_space<vmem>>, %arg2: memref<128x24xbf16, #tpu.memory_space<vmem>>, %arg3: memref<1x24xf32, #tpu.memory_space<vmem>>, %arg4: memref<128x24xf32, #tpu.memory_space<vmem>>) attributes {dimension_semantics = [#tpu.dimension_semantics<parallel>], iteration_bounds = array<i64: 1>, scalar_prefetch = 0 : i64, scratch_operands = 0 : i64, tpu.core_type = #tpu.core_type<tc>, window_params = [{transform_indices = @transform_0, window_bounds = array<i64: 128, 128>}, {pipeline_mode = #tpu.pipeline_mode<synchronous>, transform_indices = @transform_1, window_bounds = array<i64: 128, 24>}, {pipeline_mode = #tpu.pipeline_mode<synchronous>, transform_indices = @transform_2, window_bounds = array<i64: 1, 24>}, {transform_indices = @transform_3, window_bounds = array<i64: 128, 24>}]} {
    %c0 = arith.constant 0 : index
    %c0_0 = arith.constant 0 : index
    %0 = vector.load %arg1[%c0, %c0_0] : memref<128x128xbf16, #tpu.memory_space<vmem>>, vector<128x128xbf16>
    %c0_1 = arith.constant 0 : index
    %c0_2 = arith.constant 0 : index
    %1 = vector.load %arg2[%c0_1, %c0_2] : memref<128x24xbf16, #tpu.memory_space<vmem>>, vector<128x24xbf16>
    %cst = arith.constant dense<0.000000e+00> : vector<128x24xf32>
    %2 = tpu.matmul %0, %1, %cst {dimension_numbers = #tpu.dot_dimension_numbers<[1], [0], [0], [1], [0, 0, 1, 1], [], []>} : vector<128x128xbf16>, vector<128x24xbf16>, vector<128x24xf32> -> vector<128x24xf32>
    %c0_3 = arith.constant 0 : index
    %c0_4 = arith.constant 0 : index
    %3 = vector.load %arg3[%c0_3, %c0_4] : memref<1x24xf32, #tpu.memory_space<vmem>>, vector<1x24xf32>
    %4 = vector.broadcast %3 : vector<1x24xf32> to vector<128x24xf32>
    %5 = arith.addf %2, %4 : vector<128x24xf32>
    %cst_5 = arith.constant 0.000000e+00 : f32
    %6 = vector.broadcast %cst_5 : f32 to vector<128x24xf32>
    %7 = arith.subf %6, %5 : vector<128x24xf32>
    %8 = math.exp %7 : vector<128x24xf32>
    %cst_6 = arith.constant 1.000000e+00 : f32
    %9 = vector.broadcast %cst_6 : f32 to vector<128x24xf32>
    %10 = arith.addf %9, %8 : vector<128x24xf32>
    %11 = tpu.reciprocal %10 {approx = true} : vector<128x24xf32> -> vector<128x24xf32>
    %cst_7 = arith.constant 1.000000e+00 : f32
    %12 = vector.broadcast %cst_7 : f32 to vector<128x24xf32>
    %13 = arith.minimumf %11, %12 : vector<128x24xf32>
    %c0_8 = arith.constant 0 : index
    %c0_9 = arith.constant 0 : index
    %14 = vector.load %arg4[%c0_8, %c0_9] : memref<128x24xf32, #tpu.memory_space<vmem>>, vector<128x24xf32>
    tpu.vector_store %arg4[%c0_8, %c0_9], %13 {strides = array<i32>} : memref<128x24xf32, #tpu.memory_space<vmem>>, vector<128x24xf32>,
    return
  }
  func.func @transform_0(%arg0: i32) -> (i32, i32) {
    %c0_i32 = arith.constant 0 : i32
    %c0_i32_0 = arith.constant 0 : i32
    return %arg0, %c0_i32 : i32, i32
  }
  func.func @transform_1(%arg0: i32) -> (i32, i32) {
    %c0_i32 = arith.constant 0 : i32
    %c0_i32_0 = arith.constant 0 : i32
    %c0_i32_1 = arith.constant 0 : i32
    return %c0_i32, %c0_i32_0 : i32, i32
  }
  func.func @transform_2(%arg0: i32) -> (i32, i32) {
    %c0_i32 = arith.constant 0 : i32
    %c0_i32_0 = arith.constant 0 : i32
    %c0_i32_1 = arith.constant 0 : i32
    return %c0_i32, %c0_i32_0 : i32, i32
  }
  func.func @transform_3(%arg0: i32) -> (i32, i32) {
    %c0_i32 = arith.constant 0 : i32
    %c0_i32_0 = arith.constant 0 : i32
    return %arg0, %c0_i32 : i32, i32
  }
}

</mosaic_0001>

<bundles_post_ra>
// kernel: autoencoder_forward.6
= control target key start
LH: loop header
LB: loop body
LE: loop exit
PB: predicated region body
PF: predicated region fallthrough
CT: control target
= control target key end

     0   :  { %vm106_vm0 = vcmask 441344   ;;  %vm131_vm1 = vcmask 1042432   ;;  %vm312_vm2 = vcmask 257024   ;;  %s575_s1 = inlined_call_operand.vmem [shape: bf16[54,32], index: 1, kind: input, shape index: {}]   ;;  %s576_s0 = inlined_call_operand.vmem [shape: bf16[128,54], index: 0, kind: input, shape index: {}]   ;;  %s577_s2 = inlined_call_operand.vmem [shape: f32[1,32], index: 2, kind: input, shape index: {}]   ;;  %s578_s3 = inlined_call_operand.vmem [shape: bf16[128,32], index: 3, kind: output, shape index: {}]  }
   0x1   :  { %v432_v0 = vld [vmem:[%s575_s1] sm:$0xff]   ;;  %v433_v1 = vld [vmem:[%s575_s1 + $0x8] sm:$0xff]   ;;  %v434_v2 = vld [vmem:[%s575_s1 + $0x10] sm:$0xff]  }
   0x2   :  { %398 = vmatprep.subr.bf16.mxu0 %v432_v0  ;;  %422 = vmatprep.subr.bf16.mxu1 %v432_v0  ;;  %v436_v3 = vld [vmem:[%s576_s0] sm:$0xff]   ;;  %v435_v5 = vld [vmem:[%s575_s1 + $0x18] ss:$0 sps:$4 sm:$0x77]   ;;  %v438_v7 = vld [vmem:[%s576_s0 + $0x8] sm:$0xff]  }
   0x3   :  { %399 = vmatpush3.bf16.msra.mxu0 %v432_v0  ;;  %426 = vmatpush3.bf16.msra.mxu1 %v432_v0  ;;  %v437_v4 = vld [vmem:[%s576_s0 + $0x20] sm:$0xff]   ;;  %v133_v6 = vsel %vm131_vm1, %v435_v5, 0  ;;  %v439_v8 = vld [vmem:[%s576_s0 + $0x28] sm:$0xff]   ;;  %v440_v9 = vld [vmem:[%s576_s0 + $0x10] sm:$0xff]  }
   0x4   :  { %400 = vmatprep.subr.bf16.mxu0 %v433_v1  ;;  %423 = vmatprep.subr.bf16.mxu1 %v433_v1  ;;  %v441_v10 = vld [vmem:[%s576_s0 + $0x30] sm:$0xff]   ;;  %v442_v11 = vld [vmem:[%s576_s0 + $0x18] sm:$0xff]   ;;  %v333_v13 = vld [vmem:[%s577_s2] ss:$0 sm:$0xff] }
   0x5   :  { %406 = vmatprep.mubr.msk.bf16.mxu0 %vm106_vm0, %v436_v3  ;;  %414 = vmatprep.mubr.msk.bf16.mxu1 %vm106_vm0, %v437_v4  ;;  %v443_v12 = vld [vmem:[%s576_s0 + $0x38] sm:$0xff]  }
   0x7   :  { %401 = vmatpush3.bf16.msra.mxu0 %v433_v1  ;;  %427 = vmatpush3.bf16.msra.mxu1 %v433_v1 }
   0x8   :  { %402 = vmatprep.subr.bf16.mxu0 %v434_v2  ;;  %424 = vmatprep.subr.bf16.mxu1 %v434_v2 }
   0xb   :  { %403 = vmatpush3.bf16.msra.mxu0 %v434_v2  ;;  %428 = vmatpush3.bf16.msra.mxu1 %v434_v2 }
   0xc   :  { %430 = vmatprep.subr.msk.bf16.mxu0 %vm131_vm1, %v435_v5  ;;  %431 = vmatprep.subr.msk.bf16.mxu1 %vm131_vm1, %v435_v5 }
   0xf   :  { %405 = vmatpush3.bf16.msra.mxu0 %v133_v6  ;;  %429 = vmatpush3.bf16.msra.mxu1 %v133_v6 }
  0x12   :  { %407 = vmatmul.mubr.msk.bf16.vlgmr.msra.gmra.mrb[0].mxu0 %vm106_vm0, %v438_v7  ;;  %415 = vmatmul.mubr.msk.bf16.vlgmr.msra.gmra.mrb[0].mxu1 %vm106_vm0, %v439_v8 }
  0x13   :  { %410 = vmatprep.mubr.msk.bf16.mxu0 %vm106_vm0, %v440_v9  ;;  %418 = vmatprep.mubr.msk.bf16.mxu1 %vm106_vm0, %v441_v10 }
  0x1a   :  { %411 = vmatmul.mubr.msk.bf16.gmra.mrb[4].mxu0 %vm106_vm0, %v442_v11  ;;  %419 = vmatmul.mubr.msk.bf16.gmra.mrb[4].mxu1 %vm106_vm0, %v443_v12 }
  0xe5   :  { %v408_v14 = vpop.f32.mrb[0].mxu0  ;;  %v416_v15 = vpop.f32.mrb[0].mxu1 }
  0xe6   :  { %v178_v16 = vadd.f32 %v408_v14, %v333_v13  ;;  %v210_v17 = vadd.f32 %v416_v15, %v333_v13  ;;  %v169_v18 = vpop.f32.mrb[1].mxu0  ;;  %v201_v19 = vpop.f32.mrb[1].mxu1 }
  0xe7   :  { %v170_v20 = vadd.f32 %v333_v13, %v169_v18  ;;  %v202_v21 = vadd.f32 %v333_v13, %v201_v19  ;;  %v409_v22 = vpop.f32.mrb[2].mxu0  ;;  %v417_v23 = vpop.f32.mrb[2].mxu1 }
  0xe8   :  { %v234_v24 = vmax.f32 %v178_v16, 0.0  ;;  %v242_v25 = vmax.f32 %v210_v17, 0.0  ;;  %v181_v26 = vadd.f32 %v409_v22, %v333_v13  ;;  %v213_v27 = vadd.f32 %v417_v23, %v333_v13  ;;  %v172_v28 = vpop.f32.mrb[3].mxu0  ;;  %v204_v29 = vpop.f32.mrb[3].mxu1 }
  0xe9   :  { %v232_v30 = vmax.f32 %v170_v20, 0.0  ;;  %v240_v31 = vmax.f32 %v202_v21, 0.0  ;;  %v173_v32 = vadd.f32 %v333_v13, %v172_v28  ;;  %v205_v33 = vadd.f32 %v333_v13, %v204_v29 }
  0xea   :  { %v372_v34 = vpack.c.bf16 %v234_v24, %v234_v24  ;;  %v380_v35 = vpack.c.bf16 %v242_v25, %v242_v25  ;;  %v235_v36 = vmax.f32 %v181_v26, 0.0  ;;  %v243_v37 = vmax.f32 %v213_v27, 0.0 }
  0xeb   :  { %v370_v38 = vpack.c.bf16 %v232_v30, %v232_v30  ;;  %v378_v39 = vpack.c.bf16 %v240_v31, %v240_v31  ;;  %v233_v40 = vmax.f32 %v173_v32, 0.0  ;;  %v241_v41 = vmax.f32 %v205_v33, 0.0 }
  0xec   :  { %315 = vst.msk [vmem:[%s578_s3 + $0x8] sm:$0xf] %vm312_vm2, %v372_v34  ;;  %323 = vst.msk [vmem:[%s578_s3 + $0x28] sm:$0xf] %vm312_vm2, %v380_v35  ;;  %v373_v42 = vpack.c.bf16 %v235_v36, %v235_v36  ;;  %v381_v43 = vpack.c.bf16 %v243_v37, %v243_v37 }
  0xed   :  { %313 = vst.msk [vmem:[%s578_s3] sm:$0xf] %vm312_vm2, %v370_v38  ;;  %321 = vst.msk [vmem:[%s578_s3 + $0x20] sm:$0xf] %vm312_vm2, %v378_v39  ;;  %v371_v44 = vpack.c.bf16 %v233_v40, %v233_v40  ;;  %v379_v45 = vpack.c.bf16 %v241_v41, %v241_v41  ;;  %v412_v46 = vpop.f32.mrb[4].mxu0  ;;  %v420_v47 = vpop.f32.mrb[4].mxu1 }
  0xee   :  { %316 = vst.msk [vmem:[%s578_s3 + $0xc] sm:$0xf] %vm312_vm2, %v373_v42  ;;  %324 = vst.msk [vmem:[%s578_s3 + $0x2c] sm:$0xf] %vm312_vm2, %v381_v43  ;;  %v194_v48 = vadd.f32 %v412_v46, %v333_v13  ;;  %v226_v49 = vadd.f32 %v420_v47, %v333_v13  ;;  %v185_v50 = vpop.f32.mrb[5].mxu0  ;;  %v217_v51 = vpop.f32.mrb[5].mxu1 }
  0xef   :  { %314 = vst.msk [vmem:[%s578_s3 + $0x4] sm:$0xf] %vm312_vm2, %v371_v44  ;;  %322 = vst.msk [vmem:[%s578_s3 + $0x24] sm:$0xf] %vm312_vm2, %v379_v45  ;;  %v186_v52 = vadd.f32 %v333_v13, %v185_v50  ;;  %v218_v53 = vadd.f32 %v333_v13, %v217_v51  ;;  %v413_v54 = vpop.f32.mrb[6].mxu0  ;;  %v421_v55 = vpop.f32.mrb[6].mxu1 }
  0xf0   :  { %v238_v56 = vmax.f32 %v194_v48, 0.0  ;;  %v246_v57 = vmax.f32 %v226_v49, 0.0  ;;  %v197_v58 = vadd.f32 %v413_v54, %v333_v13  ;;  %v229_v59 = vadd.f32 %v421_v55, %v333_v13  ;;  %v188_v60 = vpop.f32.mrb[7].mxu0  ;;  %v220_v61 = vpop.f32.mrb[7].mxu1 }
  0xf1   :  { %v236_v62 = vmax.f32 %v186_v52, 0.0  ;;  %v244_v63 = vmax.f32 %v218_v53, 0.0  ;;  %v189_v0 = vadd.f32 %v333_v13, %v188_v60  ;;  %v221_v1 = vadd.f32 %v333_v13, %v220_v61 }
  0xf2   :  { %v376_v2 = vpack.c.bf16 %v238_v56, %v238_v56  ;;  %v384_v3 = vpack.c.bf16 %v246_v57, %v246_v57  ;;  %v239_v4 = vmax.f32 %v197_v58, 0.0  ;;  %v247_v5 = vmax.f32 %v229_v59, 0.0 }
  0xf3   :  { %v374_v6 = vpack.c.bf16 %v236_v62, %v236_v62  ;;  %v382_v7 = vpack.c.bf16 %v244_v63, %v244_v63  ;;  %v237_v8 = vmax.f32 %v189_v0, 0.0  ;;  %v245_v9 = vmax.f32 %v221_v1, 0.0 }
  0xf4   :  { %319 = vst.msk [vmem:[%s578_s3 + $0x18] sm:$0xf] %vm312_vm2, %v376_v2  ;;  %327 = vst.msk [vmem:[%s578_s3 + $0x38] sm:$0xf] %vm312_vm2, %v384_v3  ;;  %v377_v10 = vpack.c.bf16 %v239_v4, %v239_v4  ;;  %v385_v11 = vpack.c.bf16 %v247_v5, %v247_v5 }
  0xf5   :  { %317 = vst.msk [vmem:[%s578_s3 + $0x10] sm:$0xf] %vm312_vm2, %v374_v6  ;;  %325 = vst.msk [vmem:[%s578_s3 + $0x30] sm:$0xf] %vm312_vm2, %v382_v7  ;;  %v375_v12 = vpack.c.bf16 %v237_v8, %v237_v8  ;;  %v383_v13 = vpack.c.bf16 %v245_v9, %v245_v9 }
  0xf6   :  { %320 = vst.msk [vmem:[%s578_s3 + $0x1c] sm:$0xf] %vm312_vm2, %v377_v10  ;;  %328 = vst.msk [vmem:[%s578_s3 + $0x3c] sm:$0xf] %vm312_vm2, %v385_v11 }
  0xf7   :  { %318 = vst.msk [vmem:[%s578_s3 + $0x14] sm:$0xf] %vm312_vm2, %v375_v12  ;;  %326 = vst.msk [vmem:[%s578_s3 + $0x34] sm:$0xf] %vm312_vm2, %v383_v13 }

// kernel: autoencoder_forward.7
= control target key start
LH: loop header
LB: loop body
LE: loop exit
PB: predicated region body
PF: predicated region fallthrough
CT: control target
= control target key end

     0   :  { %vm204_vm0 = vcmask 261120   ;;  %vm329_vm1 = vcmask 519168   ;;  %s550_s1 = inlined_call_operand.vmem [shape: bf16[288,64], index: 1, kind: input, shape index: {}]   ;;  %s551_s0 = inlined_call_operand.vmem [shape: bf16[32,288], index: 0, kind: input, shape index: {}]   ;;  %s552_s2 = inlined_call_operand.vmem [shape: f32[1,64], index: 2, kind: input, shape index: {}]   ;;  %s553_s3 = inlined_call_operand.vmem [shape: bf16[32,64], index: 3, kind: output, shape index: {}]  }
   0x1   :  { %v413_v0 = vld [vmem:[%s550_s1 + $0x40] sm:$0xff]   ;;  %v415_v2 = vld [vmem:[%s550_s1 + $0x48] sm:$0xff]   ;;  %v417_v4 = vld [vmem:[%s550_s1 + $0x50] sm:$0xff]  }
   0x2   :  { %v414_v1 = vld [vmem:[%s550_s1] sm:$0xff]   ;;  %373 = vmatprep.subr.bf16.mxu0 %v413_v0  ;;  %v416_v3 = vld [vmem:[%s550_s1 + $0x8] sm:$0xff]   ;;  %v418_v5 = vld [vmem:[%s550_s1 + $0x10] sm:$0xff]  }
   0x3   :  { %374 = vmatpush3.bf16.msra.mxu0 %v414_v1  ;;  %v419_v6 = vld [vmem:[%s550_s1 + $0x58] sm:$0xff]   ;;  %v421_v8 = vld [vmem:[%s550_s1 + $0x60] sm:$0xff]   ;;  %v423_v11 = vld [vmem:[%s550_s1 + $0x68] sm:$0xff]  }
   0x4   :  { %375 = vmatprep.subr.bf16.mxu0 %v415_v2  ;;  %v420_v7 = vld [vmem:[%s550_s1 + $0x18] sm:$0xff]   ;;  %v422_v9 = vld [vmem:[%s550_s1 + $0x20] sm:$0xff]   ;;  %v424_v12 = vld [vmem:[%s550_s1 + $0x28] sm:$0xff]  }
   0x5   :  { %v428_v10 = vld [vmem:[%s550_s1 + $0x80] sm:$0xff]   ;;  %v425_v13 = vld [vmem:[%s550_s1 + $0x70] sm:$0xff]   ;;  %v433_v15 = vld [vmem:[%s550_s1 + $0x88] sm:$0xff]  }
   0x6   :  { %405 = vmatprep.subr.bf16.mxu1 %v428_v10  ;;  %v432_v14 = vld [vmem:[%s551_s0 + $0x4] ss:$12 sps:$4 sm:$0xff]   ;;  %v434_v16 = vld [vmem:[%s551_s0 + $0x8] ss:$12 sps:$4 sm:$0xff]   ;;  %v435_v17 = vld [vmem:[%s551_s0 + $0x20] ss:$12 sps:$4 sm:$0xff]  }
   0x7   :  { %376 = vmatpush3.bf16.msra.mxu0 %v416_v3  ;;  %406 = vmatpush3.bf16.msra.mxu1 %v428_v10  ;;  %v426_v18 = vld [vmem:[%s550_s1 + $0x30] sm:$0xff]   ;;  %v427_v19 = vld [vmem:[%s550_s1 + $0x78] sm:$0xff]   ;;  %v430_v21 = vld [vmem:[%s551_s0] ss:$12 sps:$4 sm:$0xff]  }
   0x8   :  { %377 = vmatprep.subr.bf16.mxu0 %v417_v4  ;;  %243 = vmatprep.mubr.bf16.mxu0 %v432_v14  ;;  %v429_v20 = vld [vmem:[%s550_s1 + $0x38] sm:$0xff]   ;;  %v338_v30 = vld [vmem:[%s552_s2] ss:$0 sm:$0xff] }
   0x9   :  { %407 = vmatprep.subr.bf16.mxu1 %v433_v15  ;;  %409 = vmatprep.mubr.msk.bf16.mxu1 %vm204_vm0, %v434_v16  ;;  %v436_v22 = vld [vmem:[%s551_s0 + $0x1c] ss:$12 sps:$4 sm:$0xff]   ;;  %v438_v23 = vld [vmem:[%s551_s0 + $0x18] ss:$12 sps:$4 sm:$0xff]  }
   0xb   :  { %378 = vmatpush3.bf16.msra.mxu0 %v418_v5  ;;  %408 = vmatpush3.bf16.msra.mxu1 %v433_v15 }
   0xc   :  { %379 = vmatprep.subr.bf16.mxu0 %v419_v6 }
   0xe   :  { %410 = vmatmul.mubr.msk.bf16.vlgmr.msra.gmra.mrb[0].mxu1 %vm204_vm0, %v435_v17 }
   0xf   :  { %380 = vmatpush3.bf16.msra.mxu0 %v420_v7 }
  0x10   :  { %381 = vmatprep.subr.bf16.mxu0 %v421_v8 }
  0x13   :  { %382 = vmatpush3.bf16.msra.mxu0 %v422_v9 }
  0x14   :  { %383 = vmatprep.subr.bf16.mxu0 %v423_v11 }
  0x17   :  { %384 = vmatpush3.bf16.msra.mxu0 %v424_v12 }
  0x18   :  { %385 = vmatprep.subr.bf16.mxu0 %v425_v13 }
  0x1b   :  { %386 = vmatpush3.bf16.msra.mxu0 %v426_v18 }
  0x1c   :  { %387 = vmatprep.subr.bf16.mxu0 %v427_v19 }
  0x1f   :  { %388 = vmatpush3.bf16.msra.mxu0 %v429_v20 }
  0x22   :  { %244 = vmatmul.mubr.bf16.vlgmr.msra.gmra.mrb[0].mxu0 %v430_v21 }
  0x23   :  { %251 = vmatprep.mubr.bf16.mxu0 %v436_v22 }
  0x2a   :  { %252 = vmatmul.mubr.bf16.gmra.mrb[4].mxu0 %v438_v23 }
  0xe1   :  { %v411_v24 = vpop.f32.mrb[0].mxu1 }
  0xe2   :  { %v294_v25 = vpop.f32.mrb[1].mxu1 }
  0xe3   :  { %v412_v26 = vpop.f32.mrb[2].mxu1 }
  0xe4   :  { %v297_v27 = vpop.f32.mrb[3].mxu1 }
  0xf5   :  { %v389_v28 = vpop.f32.mrb[0].mxu0 }
  0xf6   :  { %v390_v29 = vpop.f32.mrb[1].mxu0 }
  0xf7   :  { %v391_v31 = vadd.f32 %v390_v29, %v389_v28  ;;  %v392_v32 = vpop.f32.mrb[2].mxu0 }
  0xf8   :  { %v393_v33 = vpop.f32.mrb[3].mxu0 }
  0xf9   :  { %v394_v34 = vadd.f32 %v393_v33, %v392_v32  ;;  %v246_v35 = vadd.f32 %v391_v31, %v338_v30 }
  0xfb   :  { %v295_v36 = vadd.f32 %v294_v25, %v246_v35  ;;  %v249_v37 = vadd.f32 %v394_v34, %v338_v30 }
  0xfd   :  { %v309_v38 = vmax.f32 %v295_v36, 0.0  ;;  %v298_v39 = vadd.f32 %v297_v27, %v249_v37  ;;  %v395_v40 = vpop.f32.mrb[4].mxu0 }
  0xfe   :  { %v396_v41 = vpop.f32.mrb[5].mxu0 }
  0xff   :  { %v369_v42 = vpack.c.bf16 %v309_v38, %v309_v38  ;;  %v310_v43 = vmax.f32 %v298_v39, 0.0  ;;  %v397_v44 = vadd.f32 %v396_v41, %v395_v40  ;;  %v398_v45 = vpop.f32.mrb[6].mxu0 }
 0x100   :  { %v399_v46 = vpop.f32.mrb[7].mxu0 }
 0x101   :  { %330 = vst.msk [vmem:[%s553_s3] sm:$0xf] %vm329_vm1, %v369_v42  ;;  %v370_v47 = vpack.c.bf16 %v310_v43, %v310_v43  ;;  %v254_v48 = vadd.f32 %v397_v44, %v338_v30  ;;  %v400_v49 = vadd.f32 %v399_v46, %v398_v45 }
 0x103   :  { %331 = vst.msk [vmem:[%s553_s3 + $0x4] sm:$0xf] %vm329_vm1, %v370_v47  ;;  %v303_v50 = vadd.f32 %v411_v24, %v254_v48  ;;  %v257_v51 = vadd.f32 %v400_v49, %v338_v30 }
 0x105   :  { %v311_v52 = vmax.f32 %v303_v50, 0.0  ;;  %v306_v53 = vadd.f32 %v412_v26, %v257_v51 }
 0x107   :  { %v371_v54 = vpack.c.bf16 %v311_v52, %v311_v52  ;;  %v312_v55 = vmax.f32 %v306_v53, 0.0 }
 0x109   :  { %332 = vst.msk [vmem:[%s553_s3 + $0x8] sm:$0xf] %vm329_vm1, %v371_v54  ;;  %v372_v56 = vpack.c.bf16 %v312_v55, %v312_v55 }
 0x10b   :  { %333 = vst.msk [vmem:[%s553_s3 + $0xc] sm:$0xf] %vm329_vm1, %v372_v56 }

// kernel: autoencoder_forward.8
= control target key start
LH: loop header
LB: loop body
LE: loop exit
PB: predicated region body
PF: predicated region fallthrough
CT: control target
= control target key end

     0   :  { %v608_v35 = vmov 0.0   ;;  %vm609_vm0 = vmmov 0   ;;  %vm330_vm1 = vcmask 523264   ;;  %s753_s1 = inlined_call_operand.vmem [shape: bf16[576,128], index: 1, kind: input, shape index: {}]   ;;  %s754_s0 = inlined_call_operand.vmem [shape: bf16[8,576], index: 0, kind: input, shape index: {}]   ;;  %s755_s2 = inlined_call_operand.vmem [shape: f32[1,128], index: 2, kind: input, shape index: {}]   ;;  %s756_s3 = inlined_call_operand.vmem [shape: bf16[8,128], index: 3, kind: output, shape index: {}]  }
   0x1   :  { %v567_v0 = vld [vmem:[%s753_s1 + $0x40] sm:$0xff]   ;;  %v571_v4 = vld [vmem:[%s753_s1 + $0x48] sm:$0xff]   ;;  %v575_v8 = vld [vmem:[%s753_s1 + $0x50] sm:$0xff]  }
   0x2   :  { %v568_v1 = vld [vmem:[%s753_s1] sm:$0xff]   ;;  %504 = vmatprep.subr.bf16.mxu0 %v567_v0  ;;  %v572_v5 = vld [vmem:[%s753_s1 + $0x8] sm:$0xff]   ;;  %v576_v9 = vld [vmem:[%s753_s1 + $0x10] sm:$0xff]  }
   0x3   :  { %v569_v2 = vld [vmem:[%s753_s1 + $0xc0] sm:$0xff]   ;;  %505 = vmatpush3.bf16.msra.mxu0 %v568_v1  ;;  %v573_v6 = vld [vmem:[%s753_s1 + $0xc8] sm:$0xff]   ;;  %v577_v10 = vld [vmem:[%s753_s1 + $0xd0] sm:$0xff]  }
   0x4   :  { %v570_v3 = vld [vmem:[%s753_s1 + $0x80] sm:$0xff]   ;;  %526 = vmatprep.subr.bf16.mxu1 %v569_v2  ;;  %506 = vmatprep.subr.bf16.mxu0 %v571_v4  ;;  %v574_v7 = vld [vmem:[%s753_s1 + $0x88] sm:$0xff]   ;;  %v578_v11 = vld [vmem:[%s753_s1 + $0x90] sm:$0xff]  }
   0x5   :  { %527 = vmatpush3.bf16.msra.mxu1 %v570_v3  ;;  %v579_v12 = vld [vmem:[%s753_s1 + $0x58] sm:$0xff]   ;;  %v583_v16 = vld [vmem:[%s753_s1 + $0x60] sm:$0xff]   ;;  %v587_v20 = vld [vmem:[%s753_s1 + $0x68] sm:$0xff]  }
   0x6   :  { %528 = vmatprep.subr.bf16.mxu1 %v573_v6  ;;  %v580_v13 = vld [vmem:[%s753_s1 + $0x18] sm:$0xff]   ;;  %v584_v17 = vld [vmem:[%s753_s1 + $0x20] sm:$0xff]   ;;  %v588_v21 = vld [vmem:[%s753_s1 + $0x28] sm:$0xff]  }
   0x7   :  { %507 = vmatpush3.bf16.msra.mxu0 %v572_v5  ;;  %v581_v14 = vld [vmem:[%s753_s1 + $0xd8] sm:$0xff]   ;;  %v585_v18 = vld [vmem:[%s753_s1 + $0xe0] sm:$0xff]   ;;  %v589_v22 = vld [vmem:[%s753_s1 + $0xe8] sm:$0xff]  }
   0x8   :  { %508 = vmatprep.subr.bf16.mxu0 %v575_v8  ;;  %v582_v15 = vld [vmem:[%s753_s1 + $0x98] sm:$0xff]   ;;  %v586_v19 = vld [vmem:[%s753_s1 + $0xa0] sm:$0xff]   ;;  %v590_v23 = vld [vmem:[%s753_s1 + $0xa8] sm:$0xff]  }
   0x9   :  { %529 = vmatpush3.bf16.msra.mxu1 %v574_v7  ;;  %v591_v24 = vld [vmem:[%s753_s1 + $0x70] sm:$0xff]   ;;  %v595_v28 = vld [vmem:[%s753_s1 + $0x78] sm:$0xff]   ;;  %v15_v31 = vld [vmem:[%s754_s0] sm:$0xff] }
   0xa   :  { %530 = vmatprep.subr.bf16.mxu1 %v577_v10  ;;  %v592_v25 = vld [vmem:[%s753_s1 + $0x30] sm:$0xff]   ;;  %v596_v29 = vld [vmem:[%s753_s1 + $0x38] sm:$0xff]   ;;  %v462_v32 = vcombine.low %v15_v31, %v15_v31  ;;  %v463_v33 = vcombine.high %v15_v31, %v15_v31  ;;  %v16_v36 = vld [vmem:[%s754_s0 + $0x8] sm:$0xff] }
   0xb   :  { %509 = vmatpush3.bf16.msra.mxu0 %v576_v9  ;;  %v593_v26 = vld [vmem:[%s753_s1 + $0xf0] sm:$0xff]   ;;  %v597_v30 = vld [vmem:[%s753_s1 + $0xf8] sm:$0xff]   ;;  %v464_v37 = vcombine.low %v16_v36, %v16_v36  ;;  %v465_v38 = vcombine.high %v16_v36, %v16_v36  ;;  %v604_v39 = vld [vmem:[%s753_s1 + $0x100] sm:$0xff]  }
   0xc   :  { %510 = vmatprep.subr.bf16.mxu0 %v579_v12  ;;  %v594_v27 = vld [vmem:[%s753_s1 + $0xb0] sm:$0xff]   ;;  %v601_v34 = vld [vmem:[%s753_s1 + $0xb8] sm:$0xff]   ;;  %366 = vmatprep.mubr.bf16.mxu0 %v463_v33  ;;  %v605_v40 = vld [vmem:[%s753_s1 + $0x108] sm:$0xff]  }
   0xd   :  { %531 = vmatpush3.bf16.msra.mxu1 %v578_v11  ;;  %406 = vmatprep.mubr.bf16.mxu1 %v465_v38  ;;  %v606_v41 = vld [vmem:[%s753_s1 + $0x110] sm:$0xff]   ;;  %v607_v42 = vld [vmem:[%s753_s1 + $0x118] sm:$0xff]   ;;  %v461_v45 = vld [vmem:[%s755_s2] ss:$0 sm:$0xff] }
   0xe   :  { %532 = vmatprep.subr.bf16.mxu1 %v581_v14  ;;  %v600_v43 = vld [vmem:[%s754_s0 + $0x10] ss:$0 sps:$4 sm:$0xff]  }
   0xf   :  { %511 = vmatpush3.bf16.msra.mxu0 %v580_v13 }
  0x10   :  { %512 = vmatprep.subr.bf16.mxu0 %v583_v16 }
  0x11   :  { %533 = vmatpush3.bf16.msra.mxu1 %v582_v15 }
  0x12   :  { %534 = vmatprep.subr.bf16.mxu1 %v585_v18 }
  0x13   :  { %513 = vmatpush3.bf16.msra.mxu0 %v584_v17 }
  0x14   :  { %514 = vmatprep.subr.bf16.mxu0 %v587_v20 }
  0x15   :  { %535 = vmatpush3.bf16.msra.mxu1 %v586_v19 }
  0x16   :  { %536 = vmatprep.subr.bf16.mxu1 %v589_v22 }
  0x17   :  { %515 = vmatpush3.bf16.msra.mxu0 %v588_v21 }
  0x18   :  { %516 = vmatprep.subr.bf16.mxu0 %v591_v24 }
  0x19   :  { %537 = vmatpush3.bf16.msra.mxu1 %v590_v23 }
  0x1a   :  { %538 = vmatprep.subr.bf16.mxu1 %v593_v26 }
  0x1b   :  { %517 = vmatpush3.bf16.msra.mxu0 %v592_v25 }
  0x1c   :  { %518 = vmatprep.subr.bf16.mxu0 %v595_v28 }
  0x1d   :  { %539 = vmatpush3.bf16.msra.mxu1 %v594_v27 }
  0x1e   :  { %540 = vmatprep.subr.bf16.mxu1 %v597_v30 }
  0x1f   :  { %519 = vmatpush3.bf16.msra.mxu0 %v596_v29 }
  0x20   :  { %553 = vmatprep.subr.bf16.mxu0 %v608_v35 }
  0x21   :  { %541 = vmatpush3.bf16.msra.mxu1 %v601_v34 }
  0x22   :  { %367 = vmatmul.mubr.bf16.vlgmr.msra.gmra.mrb[0].mxu0 %v462_v32 }
  0x23   :  { %554 = vmatpush3.bf16.msra.mxu0 %v604_v39  ;;  %561 = vmatprep.mubr.msk.bf16.mxu0 %vm609_vm0, %v608_v35 }
  0x24   :  { %407 = vmatmul.mubr.bf16.vlgmr.msra.gmra.mrb[0].mxu1 %v464_v37  ;;  %555 = vmatprep.subr.bf16.mxu0 %v608_v35 }
  0x27   :  { %556 = vmatpush3.bf16.msra.mxu0 %v605_v40 }
  0x28   :  { %557 = vmatprep.subr.bf16.mxu0 %v608_v35 }
  0x2b   :  { %558 = vmatpush3.bf16.msra.mxu0 %v606_v41 }
  0x2c   :  { %559 = vmatprep.subr.bf16.mxu0 %v608_v35 }
  0x2f   :  { %560 = vmatpush3.bf16.msra.mxu0 %v607_v42 }
  0x32   :  { %562 = vmatmul.mubr.msk.bf16.vlgmr.msra.gmra.mrb[4].mxu0 %vm330_vm1, %v600_v43 }
  0xf5   :  { %v520_v44 = vpop.f32.mrb[0].mxu0 }
  0xf6   :  { %v521_v46 = vpop.f32.mrb[1].mxu0 }
  0xf7   :  { %v522_v47 = vadd.f32 %v521_v46, %v520_v44  ;;  %v523_v48 = vpop.f32.mrb[2].mxu0  ;;  %v542_v49 = vpop.f32.mrb[0].mxu1 }
  0xf8   :  { %v524_v50 = vpop.f32.mrb[3].mxu0  ;;  %v543_v51 = vpop.f32.mrb[1].mxu1 }
  0xf9   :  { %v369_v52 = vadd.f32 %v522_v47, %v461_v45  ;;  %v544_v53 = vadd.f32 %v543_v51, %v542_v49  ;;  %v545_v54 = vpop.f32.mrb[2].mxu1 }
  0xfa   :  { %v546_v55 = vpop.f32.mrb[3].mxu1 }
  0xfb   :  { %v409_v56 = vadd.f32 %v544_v53, %v369_v52 }
 0x105   :  { %v448_v57 = vpop.f32.mrb[4].mxu0 }
 0x106   :  { %v449_v58 = vadd.f32 %v448_v57, %v409_v56  ;;  %v563_v59 = vpop.f32.mrb[5].mxu0 }
 0x107   :  { %v451_v60 = vpop.f32.mrb[6].mxu0 }
 0x108   :  { %v454_v61 = vmax.f32 %v449_v58, 0.0  ;;  %v564_v62 = vpop.f32.mrb[7].mxu0 }
 0x10a   :  { %v455_v63 = vpack.c.bf16 %v454_v61, %v454_v61 }
 0x10c   :  { %456 = vst [vmem:[%s756_s3] sm:$0xf] %v455_v63 }

// kernel: autoencoder_forward.9
= control target key start
LH: loop header
LB: loop body
LE: loop exit
PB: predicated region body
PF: predicated region fallthrough
CT: control target
= control target key end

     0   :  { %s921_s1 = inlined_call_operand.vmem [shape: bf16[512,256], index: 1, kind: input, shape index: {}]   ;;  %s922_s0 = inlined_call_operand.vmem [shape: bf16[8,512], index: 0, kind: input, shape index: {}]   ;;  %s923_s2 = inlined_call_operand.vmem [shape: f32[1,256], index: 2, kind: input, shape index: {}]   ;;  %s924_s3 = inlined_call_operand.vmem [shape: bf16[8,256], index: 3, kind: output, shape index: {}]  }
   0x1   :  { %v597_v0 = vld [vmem:[%s921_s1 + $0x4] ss:$8 sps:$4 sm:$0xff]   ;;  %v601_v2 = vld [vmem:[%s921_s1] ss:$8 sps:$4 sm:$0xff]   ;;  %v603_v4 = vld [vmem:[%s921_s1 + $0x14] ss:$8 sps:$4 sm:$0xff]  }
   0x2   :  { %v599_v1 = vld [vmem:[%s921_s1 + $0x104] ss:$8 sps:$4 sm:$0xff]   ;;  %426 = vmatprep.subr.bf16.mxu1 %v597_v0  ;;  %v602_v3 = vld [vmem:[%s921_s1 + $0x100] ss:$8 sps:$4 sm:$0xff]   ;;  %v605_v5 = vld [vmem:[%s921_s1 + $0x114] ss:$8 sps:$4 sm:$0xff]  }
   0x3   :  { %467 = vmatprep.subr.bf16.mxu0 %v599_v1  ;;  %427 = vmatpush1.bf16.msra.mxu1 %v601_v2  ;;  %v607_v6 = vld [vmem:[%s921_s1 + $0x10] ss:$8 sps:$4 sm:$0xff]   ;;  %v609_v8 = vld [vmem:[%s921_s1 + $0x24] ss:$8 sps:$4 sm:$0xff]   ;;  %v613_v10 = vld [vmem:[%s921_s1 + $0x20] ss:$8 sps:$4 sm:$0xff]  }
   0x4   :  { %468 = vmatpush1.bf16.msra.mxu0 %v602_v3  ;;  %428 = vmatprep.subr.bf16.mxu1 %v603_v4  ;;  %v608_v7 = vld [vmem:[%s921_s1 + $0x110] ss:$8 sps:$4 sm:$0xff]   ;;  %v611_v9 = vld [vmem:[%s921_s1 + $0x124] ss:$8 sps:$4 sm:$0xff]   ;;  %v614_v11 = vld [vmem:[%s921_s1 + $0x120] ss:$8 sps:$4 sm:$0xff]  }
   0x5   :  { %469 = vmatprep.subr.bf16.mxu0 %v605_v5  ;;  %v615_v12 = vld [vmem:[%s921_s1 + $0x34] ss:$8 sps:$4 sm:$0xff]   ;;  %v619_v14 = vld [vmem:[%s921_s1 + $0x30] ss:$8 sps:$4 sm:$0xff]   ;;  %v621_v16 = vld [vmem:[%s921_s1 + $0x44] ss:$8 sps:$4 sm:$0xff]  }
   0x6   :  { %v617_v13 = vld [vmem:[%s921_s1 + $0x134] ss:$8 sps:$4 sm:$0xff]   ;;  %v620_v15 = vld [vmem:[%s921_s1 + $0x130] ss:$8 sps:$4 sm:$0xff]   ;;  %v623_v17 = vld [vmem:[%s921_s1 + $0x144] ss:$8 sps:$4 sm:$0xff]  }
   0x7   :  { %429 = vmatpush1.bf16.msra.mxu1 %v607_v6  ;;  %v625_v18 = vld [vmem:[%s921_s1 + $0x40] ss:$8 sps:$4 sm:$0xff]   ;;  %v627_v20 = vld [vmem:[%s921_s1 + $0x54] ss:$8 sps:$4 sm:$0xff]   ;;  %v631_v22 = vld [vmem:[%s921_s1 + $0x50] ss:$8 sps:$4 sm:$0xff]   ;;  %v82_v6 = vlaneseq }
   0x8   :  { %470 = vmatpush1.bf16.msra.mxu0 %v608_v7  ;;  %430 = vmatprep.subr.bf16.mxu1 %v609_v8  ;;  %v626_v19 = vld [vmem:[%s921_s1 + $0x140] ss:$8 sps:$4 sm:$0xff]   ;;  %v629_v21 = vld [vmem:[%s921_s1 + $0x154] ss:$8 sps:$4 sm:$0xff]   ;;  %v632_v23 = vld [vmem:[%s921_s1 + $0x150] ss:$8 sps:$4 sm:$0xff]  }
   0x9   :  { %471 = vmatprep.subr.bf16.mxu0 %v611_v9  ;;  %v633_v24 = vld [vmem:[%s921_s1 + $0x64] ss:$8 sps:$4 sm:$0xff]   ;;  %v637_v26 = vld [vmem:[%s921_s1 + $0x60] ss:$8 sps:$4 sm:$0xff]   ;;  %v639_v28 = vld [vmem:[%s921_s1 + $0x74] ss:$8 sps:$4 sm:$0xff]  }
   0xa   :  { %v635_v25 = vld [vmem:[%s921_s1 + $0x164] ss:$8 sps:$4 sm:$0xff]   ;;  %v638_v27 = vld [vmem:[%s921_s1 + $0x160] ss:$8 sps:$4 sm:$0xff]   ;;  %v641_v29 = vld [vmem:[%s921_s1 + $0x174] ss:$8 sps:$4 sm:$0xff]  }
   0xb   :  { %431 = vmatpush1.bf16.msra.mxu1 %v613_v10  ;;  %v643_v30 = vld [vmem:[%s921_s1 + $0x70] ss:$8 sps:$4 sm:$0xff]   ;;  %v645_v32 = vld [vmem:[%s921_s1 + $0x84] ss:$8 sps:$4 sm:$0xff]   ;;  %v649_v34 = vld [vmem:[%s921_s1 + $0x80] ss:$8 sps:$4 sm:$0xff]  }
   0xc   :  { %472 = vmatpush1.bf16.msra.mxu0 %v614_v11  ;;  %432 = vmatprep.subr.bf16.mxu1 %v615_v12  ;;  %v644_v31 = vld [vmem:[%s921_s1 + $0x170] ss:$8 sps:$4 sm:$0xff]   ;;  %v647_v33 = vld [vmem:[%s921_s1 + $0x184] ss:$8 sps:$4 sm:$0xff]   ;;  %v650_v35 = vld [vmem:[%s921_s1 + $0x180] ss:$8 sps:$4 sm:$0xff]  }
   0xd   :  { %473 = vmatprep.subr.bf16.mxu0 %v617_v13  ;;  %v651_v36 = vld [vmem:[%s921_s1 + $0x94] ss:$8 sps:$4 sm:$0xff]   ;;  %v655_v38 = vld [vmem:[%s921_s1 + $0x90] ss:$8 sps:$4 sm:$0xff]   ;;  %v657_v40 = vld [vmem:[%s921_s1 + $0xa4] ss:$8 sps:$4 sm:$0xff]  }
   0xe   :  { %v653_v37 = vld [vmem:[%s921_s1 + $0x194] ss:$8 sps:$4 sm:$0xff]   ;;  %v656_v39 = vld [vmem:[%s921_s1 + $0x190] ss:$8 sps:$4 sm:$0xff]   ;;  %v659_v41 = vld [vmem:[%s921_s1 + $0x1a4] ss:$8 sps:$4 sm:$0xff]  }
   0xf   :  { %433 = vmatpush1.bf16.msra.mxu1 %v619_v14  ;;  %v661_v42 = vld [vmem:[%s921_s1 + $0xa0] ss:$8 sps:$4 sm:$0xff]   ;;  %v663_v44 = vld [vmem:[%s921_s1 + $0xb4] ss:$8 sps:$4 sm:$0xff]   ;;  %v667_v49 = vld [vmem:[%s921_s1 + $0xb0] ss:$8 sps:$4 sm:$0xff]  }
  0x10   :  { %474 = vmatpush1.bf16.msra.mxu0 %v620_v15  ;;  %434 = vmatprep.subr.bf16.mxu1 %v621_v16  ;;  %v662_v43 = vld [vmem:[%s921_s1 + $0x1a0] ss:$8 sps:$4 sm:$0xff]   ;;  %v665_v45 = vld [vmem:[%s921_s1 + $0x1b4] ss:$8 sps:$4 sm:$0xff]   ;;  %v668_v50 = vld [vmem:[%s921_s1 + $0x1b0] ss:$8 sps:$4 sm:$0xff]  }
  0x11   :  { %475 = vmatprep.subr.bf16.mxu0 %v623_v17  ;;  %v14_v46 = vld [vmem:[%s922_s0] sm:$0xff]  ;;  %v15_v48 = vld [vmem:[%s922_s0 + $0x8] sm:$0xff]  ;;  %v675_v56 = vld [vmem:[%s921_s1 + $0xd4] ss:$8 sps:$4 sm:$0xff]   ;;  %v83_v7 = vshrl.u32 %v82_v6, 7 }
  0x12   :  { %v524_v47 = vcombine.high %v14_v46, %v14_v46  ;;  %v526_v51 = vcombine.high %v15_v48, %v15_v48  ;;  %v669_v52 = vld [vmem:[%s921_s1 + $0xc4] ss:$8 sps:$4 sm:$0xff]   ;;  %v673_v54 = vld [vmem:[%s921_s1 + $0xc0] ss:$8 sps:$4 sm:$0xff]   ;;  %v677_v57 = vld [vmem:[%s921_s1 + $0x1d4] ss:$8 sps:$4 sm:$0xff]   ;;  %v523_v4 = vcombine.low %v14_v46, %v14_v46  ;;  %v525_v5 = vcombine.low %v15_v48, %v15_v48 }
  0x13   :  { %435 = vmatpush1.bf16.msra.mxu1 %v625_v18  ;;  %v671_v53 = vld [vmem:[%s921_s1 + $0x1c4] ss:$8 sps:$4 sm:$0xff]   ;;  %v674_v55 = vld [vmem:[%s921_s1 + $0x1c0] ss:$8 sps:$4 sm:$0xff]   ;;  %v679_v58 = vld [vmem:[%s921_s1 + $0xd0] ss:$8 sps:$4 sm:$0xff]  }
  0x14   :  { %476 = vmatpush1.bf16.msra.mxu0 %v626_v19  ;;  %436 = vmatprep.subr.bf16.mxu1 %v627_v20  ;;  %v680_v59 = vld [vmem:[%s921_s1 + $0x1d0] ss:$8 sps:$4 sm:$0xff]   ;;  %v681_v60 = vld [vmem:[%s921_s1 + $0xe4] ss:$8 sps:$4 sm:$0xff]   ;;  %v685_v62 = vld [vmem:[%s921_s1 + $0xe0] ss:$8 sps:$4 sm:$0xff]  }
  0x15   :  { %477 = vmatprep.subr.bf16.mxu0 %v629_v21  ;;  %458 = vmatprep.mubr.bf16.mxu1 %v524_v47  ;;  %v683_v61 = vld [vmem:[%s921_s1 + $0x1e4] ss:$8 sps:$4 sm:$0xff]   ;;  %v686_v63 = vld [vmem:[%s921_s1 + $0x1e0] ss:$8 sps:$4 sm:$0xff]   ;;  %v687_v0 = vld [vmem:[%s921_s1 + $0xf4] ss:$8 sps:$4 sm:$0xff]  }
  0x16   :  { %499 = vmatprep.mubr.bf16.mxu0 %v526_v51  ;;  %v689_v1 = vld [vmem:[%s921_s1 + $0x1f4] ss:$8 sps:$4 sm:$0xff]   ;;  %v691_v2 = vld [vmem:[%s921_s1 + $0xf0] ss:$8 sps:$4 sm:$0xff]   ;;  %v84_v8 = vsub.s32 0, %v83_v7  ;;  %v88_v10 = vsub.s32 1, %v83_v7 }
  0x17   :  { %437 = vmatpush1.bf16.msra.mxu1 %v631_v22  ;;  %v692_v3 = vld [vmem:[%s921_s1 + $0x1f0] ss:$8 sps:$4 sm:$0xff]   ;;  %v80_v9 = vld [vmem:[%s923_s2] sm:$0x3] }
  0x18   :  { %478 = vmatpush1.bf16.msra.mxu0 %v632_v23  ;;  %438 = vmatprep.subr.bf16.mxu1 %v633_v24  ;;  %v85_v11 = vrot.slane %v80_v9, %v84_v8  ;;  %v89_v12 = vrot.slane %v80_v9, %v88_v10 }
  0x19   :  { %479 = vmatprep.subr.bf16.mxu0 %v635_v25 }
  0x1b   :  { %439 = vmatpush1.bf16.msra.mxu1 %v637_v26 }
  0x1c   :  { %480 = vmatpush1.bf16.msra.mxu0 %v638_v27  ;;  %440 = vmatprep.subr.bf16.mxu1 %v639_v28 }
  0x1d   :  { %481 = vmatprep.subr.bf16.mxu0 %v641_v29 }
  0x1f   :  { %441 = vmatpush1.bf16.msra.mxu1 %v643_v30 }
  0x20   :  { %482 = vmatpush1.bf16.msra.mxu0 %v644_v31  ;;  %442 = vmatprep.subr.bf16.mxu1 %v645_v32 }
  0x21   :  { %483 = vmatprep.subr.bf16.mxu0 %v647_v33 }
  0x23   :  { %443 = vmatpush1.bf16.msra.mxu1 %v649_v34 }
  0x24   :  { %484 = vmatpush1.bf16.msra.mxu0 %v650_v35  ;;  %444 = vmatprep.subr.bf16.mxu1 %v651_v36 }
  0x25   :  { %485 = vmatprep.subr.bf16.mxu0 %v653_v37 }
  0x27   :  { %445 = vmatpush1.bf16.msra.mxu1 %v655_v38 }
  0x28   :  { %486 = vmatpush1.bf16.msra.mxu0 %v656_v39  ;;  %446 = vmatprep.subr.bf16.mxu1 %v657_v40 }
  0x29   :  { %487 = vmatprep.subr.bf16.mxu0 %v659_v41 }
  0x2b   :  { %447 = vmatpush1.bf16.msra.mxu1 %v661_v42 }
  0x2c   :  { %488 = vmatpush1.bf16.msra.mxu0 %v662_v43  ;;  %448 = vmatprep.subr.bf16.mxu1 %v663_v44 }
  0x2d   :  { %489 = vmatprep.subr.bf16.mxu0 %v665_v45 }
  0x2f   :  { %449 = vmatpush1.bf16.msra.mxu1 %v667_v49 }
  0x30   :  { %490 = vmatpush1.bf16.msra.mxu0 %v668_v50  ;;  %450 = vmatprep.subr.bf16.mxu1 %v669_v52 }
  0x31   :  { %491 = vmatprep.subr.bf16.mxu0 %v671_v53 }
  0x33   :  { %451 = vmatpush1.bf16.msra.mxu1 %v673_v54 }
  0x34   :  { %492 = vmatpush1.bf16.msra.mxu0 %v674_v55  ;;  %452 = vmatprep.subr.bf16.mxu1 %v675_v56 }
  0x35   :  { %493 = vmatprep.subr.bf16.mxu0 %v677_v57 }
  0x37   :  { %453 = vmatpush1.bf16.msra.mxu1 %v679_v58 }
  0x38   :  { %494 = vmatpush1.bf16.msra.mxu0 %v680_v59  ;;  %454 = vmatprep.subr.bf16.mxu1 %v681_v60 }
  0x39   :  { %495 = vmatprep.subr.bf16.mxu0 %v683_v61 }
  0x3b   :  { %455 = vmatpush1.bf16.msra.mxu1 %v685_v62 }
  0x3c   :  { %496 = vmatpush1.bf16.msra.mxu0 %v686_v63  ;;  %456 = vmatprep.subr.bf16.mxu1 %v687_v0 }
  0x3d   :  { %497 = vmatprep.subr.bf16.mxu0 %v689_v1 }
  0x3f   :  { %457 = vmatpush1.bf16.msra.mxu1 %v691_v2 }
  0x40   :  { %498 = vmatpush1.bf16.msra.mxu0 %v692_v3 }
  0x42   :  { %459 = vmatmul.mubr.bf16.vlgmr.msra.gmra.mrb[0].mxu1 %v523_v4 }
  0x43   :  { %500 = vmatmul.mubr.bf16.vlgmr.msra.gmra.mrb[0].mxu0 %v525_v5 }
 0x115   :  { %v460_v13 = vpop.f32.mrb[0].mxu1 }
 0x116   :  { %v501_v14 = vpop.f32.mrb[0].mxu0  ;;  %v461_v15 = vadd.f32 %v460_v13, %v85_v11  ;;  %v462_v16 = vpop.f32.mrb[1].mxu1 }
 0x117   :  { %v503_v17 = vpop.f32.mrb[1].mxu0  ;;  %v463_v18 = vadd.f32 %v462_v16, %v89_v12  ;;  %v464_v19 = vpop.f32.mrb[2].mxu1 }
 0x118   :  { %v505_v20 = vpop.f32.mrb[2].mxu0  ;;  %v502_v21 = vadd.f32 %v501_v14, %v461_v15  ;;  %v465_v22 = vpop.f32.mrb[3].mxu1 }
 0x119   :  { %v506_v23 = vpop.f32.mrb[3].mxu0  ;;  %v504_v24 = vadd.f32 %v503_v17, %v463_v18 }
 0x11a   :  { %v508_v25 = vmax.f32 %v502_v21, 0.0 }
 0x11b   :  { %v509_v26 = vmax.f32 %v504_v24, 0.0 }
 0x11d   :  { %v592_v27 = vpack.c.bf16 %v509_v26, %v508_v25 }
 0x11f   :  { %518 = vst [vmem:[%s924_s3] sm:$0xff] %v592_v27 }

// kernel: autoencoder_forward.10
= control target key start
LH: loop header
LB: loop body
LE: loop exit
PB: predicated region body
PF: predicated region fallthrough
CT: control target
= control target key end

     0   :  { %s446_s1 = inlined_call_operand.vmem [shape: bf16[256,128], index: 1, kind: input, shape index: {}]   ;;  %s447_s0 = inlined_call_operand.vmem [shape: bf16[32,256], index: 0, kind: input, shape index: {}]   ;;  %s448_s2 = inlined_call_operand.vmem [shape: f32[1,128], index: 2, kind: input, shape index: {}]   ;;  %s449_s3 = inlined_call_operand.vmem [shape: bf16[32,128], index: 3, kind: output, shape index: {}]  }
   0x1   :  { %v335_v0 = vld [vmem:[%s446_s1 + $0x40] sm:$0xff]   ;;  %v337_v2 = vld [vmem:[%s446_s1 + $0x48] sm:$0xff]   ;;  %v339_v4 = vld [vmem:[%s446_s1 + $0x50] sm:$0xff]  }
   0x2   :  { %v336_v1 = vld [vmem:[%s446_s1] sm:$0xff]   ;;  %291 = vmatprep.subr.bf16.mxu0 %v335_v0  ;;  %319 = vmatprep.subr.bf16.mxu1 %v335_v0  ;;  %v338_v3 = vld [vmem:[%s446_s1 + $0x8] sm:$0xff]   ;;  %v340_v5 = vld [vmem:[%s446_s1 + $0x10] sm:$0xff]  }
   0x3   :  { %292 = vmatpush3.bf16.msra.mxu0 %v336_v1  ;;  %327 = vmatpush3.bf16.msra.mxu1 %v336_v1  ;;  %v341_v6 = vld [vmem:[%s446_s1 + $0x58] sm:$0xff]   ;;  %v343_v8 = vld [vmem:[%s446_s1 + $0x60] sm:$0xff]   ;;  %v345_v10 = vld [vmem:[%s446_s1 + $0x68] sm:$0xff]  }
   0x4   :  { %293 = vmatprep.subr.bf16.mxu0 %v337_v2  ;;  %320 = vmatprep.subr.bf16.mxu1 %v337_v2  ;;  %v342_v7 = vld [vmem:[%s446_s1 + $0x18] sm:$0xff]   ;;  %v344_v9 = vld [vmem:[%s446_s1 + $0x20] sm:$0xff]   ;;  %v346_v13 = vld [vmem:[%s446_s1 + $0x28] sm:$0xff]  }
   0x5   :  { %v353_v11 = vld [vmem:[%s447_s0 + $0x4] ss:$8 sps:$4 sm:$0xff]   ;;  %v356_v12 = vld [vmem:[%s447_s0 + $0x14] ss:$8 sps:$4 sm:$0xff]   ;;  %v351_v18 = vld [vmem:[%s447_s0] ss:$8 sps:$4 sm:$0xff]  }
   0x6   :  { %v347_v14 = vld [vmem:[%s446_s1 + $0x70] sm:$0xff]   ;;  %206 = vmatprep.mubr.bf16.mxu0 %v353_v11  ;;  %214 = vmatprep.mubr.bf16.mxu1 %v356_v12  ;;  %v349_v16 = vld [vmem:[%s446_s1 + $0x78] sm:$0xff]   ;;  %v251_v22 = vld [vmem:[%s448_s2] ss:$0 sm:$0xff] }
   0x7   :  { %294 = vmatpush3.bf16.msra.mxu0 %v338_v3  ;;  %328 = vmatpush3.bf16.msra.mxu1 %v338_v3  ;;  %v348_v15 = vld [vmem:[%s446_s1 + $0x30] sm:$0xff]   ;;  %v350_v17 = vld [vmem:[%s446_s1 + $0x38] sm:$0xff]  }
   0x8   :  { %295 = vmatprep.subr.bf16.mxu0 %v339_v4  ;;  %321 = vmatprep.subr.bf16.mxu1 %v339_v4  ;;  %v354_v19 = vld [vmem:[%s447_s0 + $0x10] ss:$8 sps:$4 sm:$0xff]  }
   0xb   :  { %296 = vmatpush3.bf16.msra.mxu0 %v340_v5  ;;  %329 = vmatpush3.bf16.msra.mxu1 %v340_v5 }
   0xc   :  { %297 = vmatprep.subr.bf16.mxu0 %v341_v6  ;;  %322 = vmatprep.subr.bf16.mxu1 %v341_v6 }
   0xf   :  { %298 = vmatpush3.bf16.msra.mxu0 %v342_v7  ;;  %330 = vmatpush3.bf16.msra.mxu1 %v342_v7 }
  0x10   :  { %299 = vmatprep.subr.bf16.mxu0 %v343_v8  ;;  %323 = vmatprep.subr.bf16.mxu1 %v343_v8 }
  0x13   :  { %300 = vmatpush3.bf16.msra.mxu0 %v344_v9  ;;  %331 = vmatpush3.bf16.msra.mxu1 %v344_v9 }
  0x14   :  { %301 = vmatprep.subr.bf16.mxu0 %v345_v10  ;;  %324 = vmatprep.subr.bf16.mxu1 %v345_v10 }
  0x17   :  { %302 = vmatpush3.bf16.msra.mxu0 %v346_v13  ;;  %332 = vmatpush3.bf16.msra.mxu1 %v346_v13 }
  0x18   :  { %303 = vmatprep.subr.bf16.mxu0 %v347_v14  ;;  %325 = vmatprep.subr.bf16.mxu1 %v347_v14 }
  0x1b   :  { %304 = vmatpush3.bf16.msra.mxu0 %v348_v15  ;;  %333 = vmatpush3.bf16.msra.mxu1 %v348_v15 }
  0x1c   :  { %305 = vmatprep.subr.bf16.mxu0 %v349_v16  ;;  %326 = vmatprep.subr.bf16.mxu1 %v349_v16 }
  0x1f   :  { %306 = vmatpush3.bf16.msra.mxu0 %v350_v17  ;;  %334 = vmatpush3.bf16.msra.mxu1 %v350_v17 }
  0x22   :  { %207 = vmatmul.mubr.bf16.vlgmr.msra.gmra.mrb[0].mxu0 %v351_v18  ;;  %215 = vmatmul.mubr.bf16.vlgmr.msra.gmra.mrb[0].mxu1 %v354_v19 }
  0xf5   :  { %v307_v20 = vpop.f32.mrb[0].mxu0  ;;  %v313_v21 = vpop.f32.mrb[0].mxu1 }
  0xf6   :  { %v308_v23 = vpop.f32.mrb[1].mxu0  ;;  %v314_v24 = vpop.f32.mrb[1].mxu1 }
  0xf7   :  { %v309_v25 = vadd.f32 %v308_v23, %v307_v20  ;;  %v315_v26 = vadd.f32 %v314_v24, %v313_v21  ;;  %v310_v27 = vpop.f32.mrb[2].mxu0  ;;  %v316_v28 = vpop.f32.mrb[2].mxu1 }
  0xf8   :  { %v311_v29 = vpop.f32.mrb[3].mxu0  ;;  %v317_v30 = vpop.f32.mrb[3].mxu1 }
  0xf9   :  { %v209_v31 = vadd.f32 %v309_v25, %v251_v22  ;;  %v217_v32 = vadd.f32 %v315_v26, %v251_v22  ;;  %v312_v33 = vadd.f32 %v311_v29, %v310_v27  ;;  %v318_v34 = vadd.f32 %v317_v30, %v316_v28 }
  0xfb   :  { %v212_v35 = vadd.f32 %v312_v33, %v251_v22  ;;  %v220_v36 = vadd.f32 %v318_v34, %v251_v22  ;;  %v223_v37 = vmax.f32 %v209_v31, 0.0  ;;  %v225_v38 = vmax.f32 %v217_v32, 0.0 }
  0xfd   :  { %v224_v39 = vmax.f32 %v212_v35, 0.0  ;;  %v226_v40 = vmax.f32 %v220_v36, 0.0 }
  0xff   :  { %v283_v41 = vpack.c.bf16 %v224_v39, %v223_v37  ;;  %v288_v42 = vpack.c.bf16 %v226_v40, %v225_v38 }
 0x101   :  { %284 = vst [vmem:[%s449_s3] sm:$0xff] %v283_v41   ;;  %290 = vst [vmem:[%s449_s3 + $0x8] sm:$0xff] %v288_v42  }

// kernel: autoencoder_forward.11
= control target key start
LH: loop header
LB: loop body
LE: loop exit
PB: predicated region body
PF: predicated region fallthrough
CT: control target
= control target key end

     0   :  { %vm343_vm0 = vcmask 195584   ;;  %s678_s1 = inlined_call_operand.vmem [shape: bf16[128,24], index: 1, kind: input, shape index: {}]   ;;  %s679_s0 = inlined_call_operand.vmem [shape: bf16[128,128], index: 0, kind: input, shape index: {}]   ;;  %s680_s2 = inlined_call_operand.vmem [shape: f32[1,24], index: 2, kind: input, shape index: {}]   ;;  %s681_s3 = inlined_call_operand.vmem [shape: f32[128,24], index: 3, kind: output, shape index: {}]  }
   0x1   :  { %v445_v0 = vld [vmem:[%s678_s1] sm:$0xff]   ;;  %v446_v1 = vld [vmem:[%s678_s1 + $0x8] sm:$0xff]   ;;  %v447_v2 = vld [vmem:[%s678_s1 + $0x10] sm:$0xff]  }
   0x2   :  { %397 = vmatprep.subr.bf16.mxu0 %v445_v0  ;;  %429 = vmatprep.subr.bf16.mxu1 %v445_v0  ;;  %v448_v3 = vld [vmem:[%s678_s1 + $0x18] sm:$0xff]   ;;  %v453_v4 = vld [vmem:[%s679_s0] sm:$0xff]   ;;  %v450_v7 = vld [vmem:[%s678_s1 + $0x28] sm:$0xff]  }
   0x3   :  { %398 = vmatpush3.bf16.msra.mxu0 %v445_v0  ;;  %437 = vmatpush3.bf16.msra.mxu1 %v445_v0  ;;  %v454_v5 = vld [vmem:[%s679_s0 + $0x20] sm:$0xff]   ;;  %v451_v8 = vld [vmem:[%s678_s1 + $0x30] sm:$0xff]   ;;  %v452_v9 = vld [vmem:[%s678_s1 + $0x38] sm:$0xff]  }
   0x4   :  { %399 = vmatprep.subr.bf16.mxu0 %v446_v1  ;;  %430 = vmatprep.subr.bf16.mxu1 %v446_v1  ;;  %v449_v6 = vld [vmem:[%s678_s1 + $0x20] sm:$0xff]   ;;  %v455_v10 = vld [vmem:[%s679_s0 + $0x8] sm:$0xff]   ;;  %v457_v12 = vld [vmem:[%s679_s0 + $0x10] sm:$0xff]  }
   0x5   :  { %413 = vmatprep.mubr.bf16.mxu0 %v453_v4  ;;  %421 = vmatprep.mubr.bf16.mxu1 %v454_v5  ;;  %v456_v11 = vld [vmem:[%s679_s0 + $0x28] sm:$0xff]   ;;  %v458_v13 = vld [vmem:[%s679_s0 + $0x30] sm:$0xff]   ;;  %v459_v14 = vld [vmem:[%s679_s0 + $0x18] sm:$0xff]  }
   0x6   :  { %v460_v15 = vld [vmem:[%s679_s0 + $0x38] sm:$0xff]   ;;  %v596_v16 = vld [vmem:[%s680_s2] ss:$0 sm:$0xff] }
   0x7   :  { %400 = vmatpush3.bf16.msra.mxu0 %v446_v1  ;;  %438 = vmatpush3.bf16.msra.mxu1 %v446_v1 }
   0x8   :  { %401 = vmatprep.subr.bf16.mxu0 %v447_v2  ;;  %431 = vmatprep.subr.bf16.mxu1 %v447_v2 }
   0xb   :  { %402 = vmatpush3.bf16.msra.mxu0 %v447_v2  ;;  %439 = vmatpush3.bf16.msra.mxu1 %v447_v2 }
   0xc   :  { %403 = vmatprep.subr.bf16.mxu0 %v448_v3  ;;  %432 = vmatprep.subr.bf16.mxu1 %v448_v3 }
   0xf   :  { %404 = vmatpush3.bf16.msra.mxu0 %v448_v3  ;;  %440 = vmatpush3.bf16.msra.mxu1 %v448_v3 }
  0x10   :  { %405 = vmatprep.subr.bf16.mxu0 %v449_v6  ;;  %433 = vmatprep.subr.bf16.mxu1 %v449_v6 }
  0x13   :  { %406 = vmatpush3.bf16.msra.mxu0 %v449_v6  ;;  %441 = vmatpush3.bf16.msra.mxu1 %v449_v6 }
  0x14   :  { %407 = vmatprep.subr.bf16.mxu0 %v450_v7  ;;  %434 = vmatprep.subr.bf16.mxu1 %v450_v7 }
  0x17   :  { %408 = vmatpush3.bf16.msra.mxu0 %v450_v7  ;;  %442 = vmatpush3.bf16.msra.mxu1 %v450_v7 }
  0x18   :  { %409 = vmatprep.subr.bf16.mxu0 %v451_v8  ;;  %435 = vmatprep.subr.bf16.mxu1 %v451_v8 }
  0x1b   :  { %410 = vmatpush3.bf16.msra.mxu0 %v451_v8  ;;  %443 = vmatpush3.bf16.msra.mxu1 %v451_v8 }
  0x1c   :  { %411 = vmatprep.subr.bf16.mxu0 %v452_v9  ;;  %436 = vmatprep.subr.bf16.mxu1 %v452_v9 }
  0x1f   :  { %412 = vmatpush3.bf16.msra.mxu0 %v452_v9  ;;  %444 = vmatpush3.bf16.msra.mxu1 %v452_v9 }
  0x22   :  { %414 = vmatmul.mubr.bf16.vlgmr.msra.gmra.mrb[0].mxu0 %v455_v10  ;;  %422 = vmatmul.mubr.bf16.vlgmr.msra.gmra.mrb[0].mxu1 %v456_v11 }
  0x23   :  { %417 = vmatprep.mubr.bf16.mxu0 %v457_v12  ;;  %425 = vmatprep.mubr.bf16.mxu1 %v458_v13 }
  0x2a   :  { %418 = vmatmul.mubr.bf16.gmra.mrb[4].mxu0 %v459_v14  ;;  %426 = vmatmul.mubr.bf16.gmra.mrb[4].mxu1 %v460_v15 }
  0xf5   :  { %v415_v17 = vpop.f32.mrb[0].mxu0  ;;  %v423_v18 = vpop.f32.mrb[0].mxu1 }
  0xf6   :  { %v193_v19 = vadd.f32 %v415_v17, %v596_v16  ;;  %v225_v20 = vadd.f32 %v423_v18, %v596_v16  ;;  %v184_v21 = vpop.f32.mrb[1].mxu0  ;;  %v216_v22 = vpop.f32.mrb[1].mxu1 }
  0xf7   :  { %v185_v23 = vadd.f32 %v596_v16, %v184_v21  ;;  %v217_v24 = vadd.f32 %v596_v16, %v216_v22  ;;  %v416_v25 = vpop.f32.mrb[2].mxu0  ;;  %v424_v26 = vpop.f32.mrb[2].mxu1 }
  0xf8   :  { %v249_v27 = vsub.f32 0.0, %v193_v19  ;;  %v257_v28 = vsub.f32 0.0, %v225_v20  ;;  %v196_v29 = vadd.f32 %v416_v25, %v596_v16  ;;  %v228_v30 = vadd.f32 %v424_v26, %v596_v16  ;;  %v187_v31 = vpop.f32.mrb[3].mxu0  ;;  %v219_v32 = vpop.f32.mrb[3].mxu1 }
  0xf9   :  { %v247_v33 = vsub.f32 0.0, %v185_v23  ;;  %v255_v34 = vsub.f32 0.0, %v217_v24  ;;  %v188_v35 = vadd.f32 %v596_v16, %v187_v31  ;;  %v220_v36 = vadd.f32 %v596_v16, %v219_v32 }
  0xfa   :  { %v267_v37 = vmul.f32 1.442695, %v249_v27  ;;  %v283_v38 = vmul.f32 1.442695, %v257_v28  ;;  %v250_v39 = vsub.f32 0.0, %v196_v29  ;;  %v258_v40 = vsub.f32 0.0, %v228_v30 }
  0xfb   :  { %v263_v41 = vmul.f32 1.442695, %v247_v33  ;;  %v279_v42 = vmul.f32 1.442695, %v255_v34  ;;  %v248_v43 = vsub.f32 0.0, %v188_v35  ;;  %v256_v44 = vsub.f32 0.0, %v220_v36 }
  0xfc   :  { %461 = vpow2.f32 %v267_v37  ;;  %v269_v45 = vmul.f32 1.442695, %v250_v39  ;;  %v285_v46 = vmul.f32 1.442695, %v258_v40 }
  0xfd   :  { %463 = vpow2.f32 %v283_v38  ;;  %v419_v47 = vpop.f32.mrb[4].mxu0  ;;  %v427_v48 = vpop.f32.mrb[4].mxu1  ;;  %v265_v49 = vmul.f32 1.442695, %v248_v43  ;;  %v281_v54 = vmul.f32 1.442695, %v256_v44 }
  0xfe   :  { %465 = vpow2.f32 %v263_v41  ;;  %v209_v50 = vadd.f32 %v419_v47, %v596_v16  ;;  %v241_v51 = vadd.f32 %v427_v48, %v596_v16  ;;  %v200_v52 = vpop.f32.mrb[5].mxu0  ;;  %v232_v53 = vpop.f32.mrb[5].mxu1 }
  0xff   :  { %467 = vpow2.f32 %v279_v42  ;;  %v201_v55 = vadd.f32 %v596_v16, %v200_v52  ;;  %v233_v56 = vadd.f32 %v596_v16, %v232_v53  ;;  %v420_v57 = vpop.f32.mrb[6].mxu0  ;;  %v428_v58 = vpop.f32.mrb[6].mxu1 }
 0x100   :  { %469 = vpow2.f32 %v269_v45  ;;  %v253_v59 = vsub.f32 0.0, %v209_v50  ;;  %v261_v60 = vsub.f32 0.0, %v241_v51  ;;  %v212_v61 = vadd.f32 %v420_v57, %v596_v16  ;;  %v203_v62 = vpop.f32.mrb[7].mxu0  ;;  %v235_v63 = vpop.f32.mrb[7].mxu1 }
 0x101   :  { %471 = vpow2.f32 %v285_v46  ;;  %v251_v0 = vsub.f32 0.0, %v201_v55  ;;  %v259_v1 = vsub.f32 0.0, %v233_v56  ;;  %v244_v18 = vadd.f32 %v428_v58, %v596_v16 }
 0x102   :  { %473 = vpow2.f32 %v265_v49  ;;  %v275_v2 = vmul.f32 1.442695, %v253_v59  ;;  %v291_v3 = vmul.f32 1.442695, %v261_v60  ;;  %v254_v4 = vsub.f32 0.0, %v212_v61 }
 0x103   :  { %475 = vpow2.f32 %v281_v54  ;;  %v271_v5 = vmul.f32 1.442695, %v251_v0  ;;  %v287_v6 = vmul.f32 1.442695, %v259_v1  ;;  %v204_v21 = vadd.f32 %v596_v16, %v203_v62 }
 0x104   :  { %477 = vpow2.f32 %v275_v2  ;;  %v277_v7 = vmul.f32 1.442695, %v254_v4  ;;  %v236_v24 = vadd.f32 %v596_v16, %v235_v63  ;;  %v262_v29 = vsub.f32 0.0, %v244_v18 }
 0x105   :  { %479 = vpow2.f32 %v291_v3  ;;  %v252_v32 = vsub.f32 0.0, %v204_v21 }
 0x106   :  { %v462_v8 = vpop.eup %461  ;;  %481 = vpow2.f32 %v271_v5  ;;  %v260_v35 = vsub.f32 0.0, %v236_v24  ;;  %v293_v39 = vmul.f32 1.442695, %v262_v29 }
 0x107   :  { %v464_v9 = vpop.eup %463  ;;  %v297_v10 = vadd.f32 1.0, %v462_v8  ;;  %483 = vpow2.f32 %v287_v6  ;;  %v273_v42 = vmul.f32 1.442695, %v252_v32 }
 0x108   :  { %v466_v11 = vpop.eup %465  ;;  %v305_v12 = vadd.f32 1.0, %v464_v9  ;;  %485 = vpow2.f32 %v277_v7  ;;  %v289_v45 = vmul.f32 1.442695, %v260_v35 }
 0x109   :  { %v468_v13 = vpop.eup %467  ;;  %487 = vrcp.f32 %v297_v10  ;;  %v295_v14 = vadd.f32 1.0, %v466_v11 }
 0x10a   :  { %v470_v15 = vpop.eup %469  ;;  %489 = vrcp.f32 %v305_v12  ;;  %v303_v17 = vadd.f32 1.0, %v468_v13 }
 0x10b   :  { %v472_v19 = vpop.eup %471  ;;  %491 = vrcp.f32 %v295_v14  ;;  %v298_v20 = vadd.f32 1.0, %v470_v15 }
 0x10c   :  { %v474_v22 = vpop.eup %473  ;;  %493 = vrcp.f32 %v303_v17  ;;  %v306_v23 = vadd.f32 1.0, %v472_v19 }
 0x10d   :  { %v476_v25 = vpop.eup %475  ;;  %495 = vrcp.f32 %v298_v20  ;;  %v296_v26 = vadd.f32 1.0, %v474_v22 }
 0x10e   :  { %v478_v27 = vpop.eup %477  ;;  %497 = vrcp.f32 %v306_v23  ;;  %v304_v28 = vadd.f32 1.0, %v476_v25 }
 0x10f   :  { %v480_v30 = vpop.eup %479  ;;  %499 = vrcp.f32 %v296_v26  ;;  %v301_v31 = vadd.f32 1.0, %v478_v27 }
 0x110   :  { %v482_v33 = vpop.eup %481  ;;  %501 = vrcp.f32 %v304_v28  ;;  %v309_v34 = vadd.f32 1.0, %v480_v30 }
 0x111   :  { %v484_v36 = vpop.eup %483  ;;  %503 = vrcp.f32 %v301_v31  ;;  %v299_v37 = vadd.f32 1.0, %v482_v33 }
 0x112   :  { %v486_v38 = vpop.eup %485  ;;  %505 = vrcp.f32 %v309_v34  ;;  %v307_v16 = vadd.f32 1.0, %v484_v36 }
 0x113   :  { %v488_v40 = vpop.eup %487  ;;  %507 = vrcp.f32 %v299_v37  ;;  %v302_v41 = vadd.f32 1.0, %v486_v38 }
 0x114   :  { %v490_v43 = vpop.eup %489  ;;  %v329_v44 = vmin.f32 %v488_v40, 1.0  ;;  %509 = vrcp.f32 %v307_v16 }
 0x115   :  { %v492_v46 = vpop.eup %491  ;;  %v337_v47 = vmin.f32 %v490_v43, 1.0  ;;  %511 = vrcp.f32 %v302_v41 }
 0x116   :  { %v494_v48 = vpop.eup %493  ;;  %346 = vst.msk [vmem:[%s681_s3 + $0x10] sm:$0xff] %vm343_vm0, %v329_v44  ;;  %v327_v49 = vmin.f32 %v492_v46, 1.0  ;;  %513 = vpow2.f32 %v293_v39 }
 0x117   :  { %v496_v50 = vpop.eup %495  ;;  %354 = vst.msk [vmem:[%s681_s3 + $0x50] sm:$0xff] %vm343_vm0, %v337_v47  ;;  %v335_v51 = vmin.f32 %v494_v48, 1.0  ;;  %515 = vpow2.f32 %v273_v42 }
 0x118   :  { %v498_v52 = vpop.eup %497  ;;  %344 = vst.msk [vmem:[%s681_s3] sm:$0xff] %vm343_vm0, %v327_v49  ;;  %v330_v53 = vmin.f32 %v496_v50, 1.0  ;;  %517 = vpow2.f32 %v289_v45 }
 0x119   :  { %v500_v54 = vpop.eup %499  ;;  %352 = vst.msk [vmem:[%s681_s3 + $0x40] sm:$0xff] %vm343_vm0, %v335_v51  ;;  %v338_v55 = vmin.f32 %v498_v52, 1.0 }
 0x11a   :  { %v502_v56 = vpop.eup %501  ;;  %347 = vst.msk [vmem:[%s681_s3 + $0x18] sm:$0xff] %vm343_vm0, %v330_v53  ;;  %v328_v57 = vmin.f32 %v500_v54, 1.0 }
 0x11b   :  { %v504_v58 = vpop.eup %503  ;;  %355 = vst.msk [vmem:[%s681_s3 + $0x58] sm:$0xff] %vm343_vm0, %v338_v55  ;;  %v336_v59 = vmin.f32 %v502_v56, 1.0 }
 0x11c   :  { %v506_v60 = vpop.eup %505  ;;  %345 = vst.msk [vmem:[%s681_s3 + $0x8] sm:$0xff] %vm343_vm0, %v328_v57  ;;  %v333_v61 = vmin.f32 %v504_v58, 1.0 }
 0x11d   :  { %v508_v62 = vpop.eup %507  ;;  %353 = vst.msk [vmem:[%s681_s3 + $0x48] sm:$0xff] %vm343_vm0, %v336_v59  ;;  %v341_v63 = vmin.f32 %v506_v60, 1.0 }
 0x11e   :  { %v510_v0 = vpop.eup %509  ;;  %350 = vst.msk [vmem:[%s681_s3 + $0x30] sm:$0xff] %vm343_vm0, %v333_v61  ;;  %v331_v1 = vmin.f32 %v508_v62, 1.0 }
 0x11f   :  { %v512_v2 = vpop.eup %511  ;;  %358 = vst.msk [vmem:[%s681_s3 + $0x70] sm:$0xff] %vm343_vm0, %v341_v63  ;;  %v339_v3 = vmin.f32 %v510_v0, 1.0 }
 0x120   :  { %v514_v4 = vpop.eup %513  ;;  %348 = vst.msk [vmem:[%s681_s3 + $0x20] sm:$0xff] %vm343_vm0, %v331_v1  ;;  %v334_v5 = vmin.f32 %v512_v2, 1.0 }
 0x121   :  { %v516_v6 = vpop.eup %515  ;;  %356 = vst.msk [vmem:[%s681_s3 + $0x60] sm:$0xff] %vm343_vm0, %v339_v3  ;;  %v310_v7 = vadd.f32 1.0, %v514_v4 }
 0x122   :  { %v518_v8 = vpop.eup %517  ;;  %351 = vst.msk [vmem:[%s681_s3 + $0x38] sm:$0xff] %vm343_vm0, %v334_v5  ;;  %v300_v9 = vadd.f32 1.0, %v516_v6 }
 0x123   :  { %519 = vrcp.f32 %v310_v7  ;;  %v308_v10 = vadd.f32 1.0, %v518_v8 }
 0x124   :  { %521 = vrcp.f32 %v300_v9 }
 0x125   :  { %523 = vrcp.f32 %v308_v10 }
 0x12d   :  { %v520_v11 = vpop.eup %519 }
 0x12e   :  { %v522_v12 = vpop.eup %521  ;;  %v342_v13 = vmin.f32 %v520_v11, 1.0 }
 0x12f   :  { %v524_v14 = vpop.eup %523  ;;  %v332_v15 = vmin.f32 %v522_v12, 1.0 }
 0x130   :  { %359 = vst.msk [vmem:[%s681_s3 + $0x78] sm:$0xff] %vm343_vm0, %v342_v13  ;;  %v340_v17 = vmin.f32 %v524_v14, 1.0 }
 0x131   :  { %349 = vst.msk [vmem:[%s681_s3 + $0x28] sm:$0xff] %vm343_vm0, %v332_v15 }
 0x132   :  { %357 = vst.msk [vmem:[%s681_s3 + $0x68] sm:$0xff] %vm343_vm0, %v340_v17 }

</bundles_post_ra>
